<compile_context>
chip_gen: v6e
topology: v6e:2x2x1
jax: 0.10.0
libtpu: 0.0.40
codegen_flags: <defaults>
</compile_context>

<pallas_src>
import functools

import jax
import jax.numpy as jnp
from jax.experimental import pallas as pl
from jax.experimental.pallas import tpu as pltpu

_LANE = 128      # lane width (last dim)
_SUBLANE = 8     # sublane width (second-to-last dim)


def _round_up(n: int, m: int) -> int:
    return ((n + m - 1) // m) * m


def _pad2d(a, rows: int, cols: int):
    r, c = a.shape
    return jnp.pad(a, ((0, rows - r), (0, cols - c)))


def _mlp_kernel(x_ref, w1_ref, b1_ref, w2_ref, b2_ref, w3_ref, b3_ref, o_ref):
    hi = jax.lax.Precision.HIGHEST
    # fc1 + ReLU   (f32 accumulate on the MXU, one vadd+vmax on the VPU)
    h1 = jnp.dot(x_ref[...], w1_ref[...],
                 preferred_element_type=jnp.float32, precision=hi)
    h1 = jnp.maximum(h1 + b1_ref[...], 0.0)
    # fc2 + ReLU
    h2 = jnp.dot(h1, w2_ref[...],
                 preferred_element_type=jnp.float32, precision=hi)
    h2 = jnp.maximum(h2 + b2_ref[...], 0.0)
    # fc3 (no activation); bias folded into the output store
    out = jnp.dot(h2, w3_ref[...],
                  preferred_element_type=jnp.float32, precision=hi)
    o_ref[...] = (out + b3_ref[...]).astype(o_ref.dtype)


def pad_params(params):
    """Pre-pad weights/biases ONCE to lane multiples (run at init, not per call).

    100x200 -> 128x256, 200x100 -> 256x128, 100x10 -> 128x128."""
    w1, b1, w2, b2, w3, b3 = params
    d_in_p = _round_up(w1.shape[0], _LANE)
    h1_p = _round_up(w1.shape[1], _LANE)
    h2_p = _round_up(w2.shape[1], _LANE)
    d_out_p = _round_up(w3.shape[1], _LANE)
    return (
        _pad2d(w1, d_in_p, h1_p), _pad2d(b1, 1, h1_p),
        _pad2d(w2, h1_p, h2_p), _pad2d(b2, 1, h2_p),
        _pad2d(w3, h2_p, d_out_p), _pad2d(b3, 1, d_out_p),
    )


@functools.partial(jax.jit, static_argnames=("d_out",))
def testnet_forward(x, padded_params, d_out: int):
    """Fused MLP forward.  `padded_params` must come from pad_params().

    Pads only x per call, runs a single grid point with everything
    VMEM-resident, then slices back to the logical output shape.  The whole
    thing (pad + kernel + slice) compiles to one executable."""
    w1p, b1p, w2p, b2p, w3p, b3p = padded_params
    B, d_in = x.shape

    Bp = _round_up(B, _SUBLANE)
    d_in_p = w1p.shape[0]
    d_out_p = w3p.shape[1]
    assert d_in <= d_in_p and d_out <= d_out_p

    xp = _pad2d(x, Bp, d_in_p)

    # Whole-array VMEM residency; no grid, no block_shape/index_map needed.
    vmem = pl.BlockSpec(memory_space=pltpu.MemorySpace.VMEM)

    itemsize = jnp.dtype(x.dtype).itemsize
    operands = (xp, w1p, b1p, w2p, b2p, w3p, b3p)
    h1_p, h2_p = w1p.shape[1], w2p.shape[1]
    flops = 2 * Bp * (d_in_p * h1_p + h1_p * h2_p + h2_p * d_out_p)
    bytes_accessed = (
        sum(int(a.size) * itemsize for a in operands) + Bp * d_out_p * itemsize
    )

    out_p = pl.pallas_call(
        _mlp_kernel,
        out_shape=jax.ShapeDtypeStruct((Bp, d_out_p), x.dtype),
        in_specs=[vmem] * len(operands),
        out_specs=vmem,
        cost_estimate=pl.CostEstimate(
            flops=flops, transcendentals=0, bytes_accessed=bytes_accessed
        ),
    )(*operands)

    return out_p[:B, :d_out]


def init_params(key, d_input=100, d_output=10, dtype=jnp.float32):
    """Deterministic init; mimics PyTorch nn.Linear (uniform +/- 1/sqrt(fan_in)).

    Weights are stored already transposed to [in, out]."""
    dims = [(d_input, 200), (200, 100), (100, d_output)]
    params = []
    for (fan_in, fan_out) in dims:
        key, kw, kb = jax.random.split(key, 3)
        bound = 1.0 / (fan_in ** 0.5)
        w = jax.random.uniform(kw, (fan_in, fan_out), dtype, -bound, bound)
        b = jax.random.uniform(kb, (1, fan_out), dtype, -bound, bound)
        params.extend([w, b])
    return tuple(params)


def _reference(x, params):
    hi = jax.lax.Precision.HIGHEST
    w1, b1, w2, b2, w3, b3 = params
    h = jax.nn.relu(jnp.dot(x, w1, precision=hi) + b1)
    h = jax.nn.relu(jnp.dot(h, w2, precision=hi) + b2)
    return jnp.dot(h, w3, precision=hi) + b3


if __name__ == "__main__":
    key = jax.random.PRNGKey(0)
    k_x, k_p = jax.random.split(key)

    B, D_IN, D_OUT = 8, 100, 10
    x = jax.random.normal(k_x, (B, D_IN), jnp.float32)
    params = init_params(k_p, D_IN, D_OUT)

    # One-time weight padding (hoisted out of the per-call path).
    padded_params = jax.tree_util.tree_map(jax.block_until_ready,
                                           pad_params(params))

    out = testnet_forward(x, padded_params, D_OUT)
    out = jax.block_until_ready(out)

    ref = _reference(x, params)
    assert out.shape == (B, D_OUT)
    assert jnp.allclose(out, ref, atol=1e-4, rtol=1e-4)

    print("KERNEL_OK")
</pallas_src>

<mosaic_0001>
module attributes {stable_mosaic.version = 11 : i64} {
  func.func @_mlp_kernel(%arg0: memref<8x128xf32, #tpu.memory_space<vmem>>, %arg1: memref<128x256xf32, #tpu.memory_space<vmem>>, %arg2: memref<1x256xf32, #tpu.memory_space<vmem>>, %arg3: memref<256x128xf32, #tpu.memory_space<vmem>>, %arg4: memref<1x128xf32, #tpu.memory_space<vmem>>, %arg5: memref<128x128xf32, #tpu.memory_space<vmem>>, %arg6: memref<1x128xf32, #tpu.memory_space<vmem>>, %arg7: memref<8x128xf32, #tpu.memory_space<vmem>>) attributes {dimension_semantics = [], scalar_prefetch = 0 : i64, scratch_operands = 0 : i64, tpu.core_type = #tpu.core_type<tc>} {
    %c0 = arith.constant 0 : index
    %c0_0 = arith.constant 0 : index
    %0 = vector.load %arg0[%c0, %c0_0] : memref<8x128xf32, #tpu.memory_space<vmem>>, vector<8x128xf32>
    %c0_1 = arith.constant 0 : index
    %c0_2 = arith.constant 0 : index
    %1 = vector.load %arg1[%c0_1, %c0_2] : memref<128x256xf32, #tpu.memory_space<vmem>>, vector<128x256xf32>
    %cst = arith.constant dense<0.000000e+00> : vector<8x256xf32>
    %2 = tpu.matmul %0, %1, %cst {dimension_numbers = #tpu.dot_dimension_numbers<[1], [0], [0], [1], [0, 0, 1, 1], [], []>, precision = #tpu.contract_precision<fp32>} : vector<8x128xf32>, vector<128x256xf32>, vector<8x256xf32> -> vector<8x256xf32>
    %c0_3 = arith.constant 0 : index
    %c0_4 = arith.constant 0 : index
    %3 = vector.load %arg2[%c0_3, %c0_4] : memref<1x256xf32, #tpu.memory_space<vmem>>, vector<1x256xf32>
    %4 = vector.broadcast %3 : vector<1x256xf32> to vector<8x256xf32>
    %5 = arith.addf %2, %4 : vector<8x256xf32>
    %cst_5 = arith.constant 0.000000e+00 : f32
    %6 = vector.broadcast %cst_5 : f32 to vector<8x256xf32>
    %7 = arith.maximumf %5, %6 : vector<8x256xf32>
    %c0_6 = arith.constant 0 : index
    %c0_7 = arith.constant 0 : index
    %8 = vector.load %arg3[%c0_6, %c0_7] : memref<256x128xf32, #tpu.memory_space<vmem>>, vector<256x128xf32>
    %cst_8 = arith.constant dense<0.000000e+00> : vector<8x128xf32>
    %9 = tpu.matmul %7, %8, %cst_8 {dimension_numbers = #tpu.dot_dimension_numbers<[1], [0], [0], [1], [0, 0, 1, 1], [], []>, precision = #tpu.contract_precision<fp32>} : vector<8x256xf32>, vector<256x128xf32>, vector<8x128xf32> -> vector<8x128xf32>
    %c0_9 = arith.constant 0 : index
    %c0_10 = arith.constant 0 : index
    %10 = vector.load %arg4[%c0_9, %c0_10] : memref<1x128xf32, #tpu.memory_space<vmem>>, vector<1x128xf32>
    %11 = vector.broadcast %10 : vector<1x128xf32> to vector<8x128xf32>
    %12 = arith.addf %9, %11 : vector<8x128xf32>
    %cst_11 = arith.constant 0.000000e+00 : f32
    %13 = vector.broadcast %cst_11 : f32 to vector<8x128xf32>
    %14 = arith.maximumf %12, %13 : vector<8x128xf32>
    %c0_12 = arith.constant 0 : index
    %c0_13 = arith.constant 0 : index
    %15 = vector.load %arg5[%c0_12, %c0_13] : memref<128x128xf32, #tpu.memory_space<vmem>>, vector<128x128xf32>
    %cst_14 = arith.constant dense<0.000000e+00> : vector<8x128xf32>
    %16 = tpu.matmul %14, %15, %cst_14 {dimension_numbers = #tpu.dot_dimension_numbers<[1], [0], [0], [1], [0, 0, 1, 1], [], []>, precision = #tpu.contract_precision<fp32>} : vector<8x128xf32>, vector<128x128xf32>, vector<8x128xf32> -> vector<8x128xf32>
    %c0_15 = arith.constant 0 : index
    %c0_16 = arith.constant 0 : index
    %17 = vector.load %arg6[%c0_15, %c0_16] : memref<1x128xf32, #tpu.memory_space<vmem>>, vector<1x128xf32>
    %18 = vector.broadcast %17 : vector<1x128xf32> to vector<8x128xf32>
    %19 = arith.addf %16, %18 : vector<8x128xf32>
    %c0_17 = arith.constant 0 : index
    %c0_18 = arith.constant 0 : index
    %20 = vector.load %arg7[%c0_17, %c0_18] : memref<8x128xf32, #tpu.memory_space<vmem>>, vector<8x128xf32>
    tpu.vector_store %arg7[%c0_17, %c0_18], %19 {strides = array<i32>} : memref<8x128xf32, #tpu.memory_space<vmem>>, vector<8x128xf32>,
    return
  }
}

</mosaic_0001>

<bundles_post_ra>
// kernel: testnet_forward.1
= control target key start
LH: loop header
LB: loop body
LE: loop exit
PB: predicated region body
PF: predicated region fallthrough
CT: control target
= control target key end

     0   :  { %12 = vsyncpa [#allocation3], 0  ;;  %s4700_s0 = inlined_call_operand.vmem [shape: f32[8,128], index: 0, kind: input, shape index: {}]   ;;  %s4701_s1 = inlined_call_operand.hbm [shape: f32[128,256], index: 1, kind: input, shape index: {}]   ;;  %s4702_s2 = inlined_call_operand.vmem [shape: f32[1,256], index: 2, kind: input, shape index: {}]   ;;  %s4703_s3 = inlined_call_operand.hbm [shape: f32[256,128], index: 3, kind: input, shape index: {}]   ;;  %s4704_s4 = inlined_call_operand.vmem [shape: f32[1,128], index: 4, kind: input, shape index: {}]   ;;  %s4705_s5 = inlined_call_operand.hbm [shape: f32[128,128], index: 5, kind: input, shape index: {}]   ;;  %s4706_s6 = inlined_call_operand.vmem [shape: f32[1,128], index: 6, kind: input, shape index: {}]   ;;  %s4707_s7 = inlined_call_operand.hbm [shape: f32[8,128], index: 7, kind: output, shape index: {}]  }
   0x1   :  { %13 = vsyncpa [#allocation6], 0 }
   0x2   :  { %14 = vsyncpa [#allocation4], 0  ;;  %s3173_s24 = smov [#allocation5]  }
   0x3   :  { %s36_s25 = sshll.u32 %s3173_s24, 4  ;;  %s37_s25 = int_to_ptr.vmem [resolvable:$true] %s36_s25 }
   0x4   :  { %s3095_s26 = scalar_lea.vmem %s37_s25, 4096  ;;  %p3100_p1 = scmp.lt.s32.totalorder %s37_s25, %s37_s25 }
   0x5   :  { %p3096_p0 = scmp.ne.s32.totalorder %s37_s25, %s3095_s26  ;;  %p3101_p2 = scmp.lt.s32.totalorder %s3095_s26, %s3095_s26 }
   0x7   :  { %p3102_p3 = por %p3101_p2, %p3100_p1 }
   0x9   :  { %p3103_p4 = pnand %p3102_p3, %p3096_p0 }
   0xb   :  { %3106 = shalt.err (!%p3103_p4)
}
   0xc   :  { %s3174_s27 = smov 128   ;;  %s3175_s28 = smov 8  }
   0xd   :  { %42 = dma.hbm_to_vmem [thread:$0]  %s4703_s3, 4096, %s37_s25, [#allocation6], %s3174_s27, %s3174_s27, %s3175_s28  }
   0xe   :  { %s3176_s8 = smov [#allocation2]  }
   0xf   :  { %s22_s9 = sshll.u32 %s3176_s8, 4  ;;  %s23_s9 = int_to_ptr.vmem [resolvable:$true] %s22_s9 }
  0x10   :  { %s3115_s10 = scalar_lea.vmem %s23_s9, 4096  ;;  %p3120_p6 = scmp.lt.s32.totalorder %s23_s9, %s23_s9 }
  0x11   :  { %p3116_p5 = scmp.ne.s32.totalorder %s23_s9, %s3115_s10  ;;  %p3121_p7 = scmp.lt.s32.totalorder %s3115_s10, %s3115_s10 }
  0x13   :  { %p3122_p8 = por %p3121_p7, %p3120_p6 }
  0x15   :  { %p3123_p9 = pnand %p3122_p8, %p3116_p5 }
  0x17   :  { %3126 = shalt.err (!%p3123_p9)
}
  0x18   :  { %s3177_s11 = smov 256   ;;  %s3178_s12 = smov 16  }
  0x19   :  { %28 = dma.hbm_to_vmem [thread:$0]  %s4701_s1, 4096, %s23_s9, [#allocation3], %s3177_s11, %s3177_s11, %s3178_s12  }
  0x1a   :  { %s3179_s15 = smov [#allocation7]  }
  0x1b   :  { %s50_s16 = sshll.u32 %s3179_s15, 4  ;;  %s51_s16 = int_to_ptr.vmem [resolvable:$true] %s50_s16 }
  0x1c   :  { %s3135_s3 = scalar_lea.vmem %s51_s16, 2048  ;;  %p3140_p11 = scmp.lt.s32.totalorder %s51_s16, %s51_s16 }
  0x1d   :  { %p3136_p10 = scmp.ne.s32.totalorder %s51_s16, %s3135_s3  ;;  %p3141_p12 = scmp.lt.s32.totalorder %s3135_s3, %s3135_s3 }
  0x1f   :  { %p3142_p13 = por %p3141_p12, %p3140_p11 }
  0x21   :  { %p3143_p0 = pnand %p3142_p13, %p3136_p10 }
  0x23   :  { %3146 = shalt.err (!%p3143_p0)
}
  0x24   :  { %56 = dma.hbm_to_vmem [thread:$0]  %s4705_s5, 2048, %s51_s16, [#allocation6], %s3174_s27, %s3174_s27, %s3175_s28  }
  0x25   :  { %3167 = dma.done.wait [#allocation3], 4096  }
  0x26   :  { %3168 = vsyncadd [#allocation3], 4294963200 }
  0x27   :  { %3169 = dma.done.wait [#allocation6], 6144  }
  0x28   :  { %3170 = vsyncadd [#allocation6], 4294961152  ;;  %v4722_v0 = vmov 0.0   ;;  %v100_v1 = vld [vmem:[#allocation2 + $0xf8] sm:$0xff]  ;;  %v99_v2 = vld [vmem:[#allocation2 + $0xf0] sm:$0xff]  ;;  %vm3181_vm0 = vmmov 0  }
  0x29   :  { %209 = vmatprep.mubr.f32.mxu0 %v4722_v0  ;;  %445 = vmatprep.mubr.f32.mxu1 %v4722_v0  ;;  %v98_v3 = vld [vmem:[#allocation2 + $0xe8] sm:$0xff]  ;;  %v3234_v4 = vand.u32 4294901760, %v100_v1  ;;  %v3236_v5 = vand.u32 4294901760, %v99_v2  ;;  %v97_v7 = vld [vmem:[#allocation2 + $0xe0] sm:$0xff]  ;;  %v96_v8 = vld [vmem:[#allocation2 + $0xd8] sm:$0xff]  ;;  %s3182_s22 = smov [#allocation8]  }
  0x2a   :  { %v3238_v6 = vand.u32 4294901760, %v98_v3  ;;  %v95_v9 = vld [vmem:[#allocation2 + $0xd0] sm:$0xff]  ;;  %v3240_v10 = vand.u32 4294901760, %v97_v7  ;;  %v3242_v11 = vand.u32 4294901760, %v96_v8  ;;  %v94_v13 = vld [vmem:[#allocation2 + $0xc8] sm:$0xff]  ;;  %v93_v14 = vld [vmem:[#allocation2 + $0xc0] sm:$0xff] }
  0x2b   :  { %v3244_v12 = vand.u32 4294901760, %v95_v9  ;;  %v92_v15 = vld [vmem:[#allocation2 + $0xb8] sm:$0xff]  ;;  %114 = vmatprep.subr.mxu0 %v3234_v4  ;;  %v3247_v16 = vand.u32 4294901760, %v94_v13  ;;  %v3249_v17 = vand.u32 4294901760, %v93_v14  ;;  %v3254_v19 = vsub.f32 %v100_v1, %v3234_v4  ;;  %v3256_v20 = vld [vmem:[#allocation2 + $0xb0] sm:$0xff]  ;;  %v3258_v21 = vld [vmem:[#allocation2 + $0xa8] sm:$0xff] }
  0x2c   :  { %v3251_v18 = vand.u32 4294901760, %v92_v15  ;;  %v3260_v22 = vld [vmem:[#allocation2 + $0xa0] sm:$0xff]  ;;  %116 = vmatpush1.msra.mxu0 %v3236_v5  ;;  %v3264_v23 = vand.u32 4294901760, %v3256_v20  ;;  %v3267_v24 = vsub.f32 %v99_v2, %v3236_v5  ;;  %v3270_v25 = vand.u32 4294901760, %v3258_v21  ;;  %v3275_v27 = vld [vmem:[#allocation2 + $0x98] sm:$0xff]  ;;  %v3277_v28 = vld [vmem:[#allocation2 + $0x90] sm:$0xff] }
  0x2d   :  { %v3273_v26 = vsub.f32 %v98_v3, %v3238_v6  ;;  %v3279_v29 = vld [vmem:[#allocation2 + $0x88] sm:$0xff]  ;;  %118 = vmatprep.subr.mxu0 %v3238_v6  ;;  %v4720_v30 = vand.u32 4294901760, %v3254_v19  ;;  %v3284_v31 = vand.u32 4294901760, %v3260_v22  ;;  %v3287_v32 = vsub.f32 %v97_v7, %v3240_v10  ;;  %v3301_v38 = vld [vmem:[#allocation2 + $0x80] sm:$0xff]  ;;  %v3325_v47 = vld [vmem:[#allocation2 + $0x78] sm:$0xff]  ;;  %s2543_s23 = sshll.u32 %s3182_s22, 4  ;;  %s2544_s23 = int_to_ptr.vmem [resolvable:$true] %s2543_s23 }
  0x2e   :  { %v3290_v33 = vand.u32 4294901760, %v3275_v27  ;;  %120 = vmatpush1.msra.mxu0 %v3240_v10  ;;  %v4719_v34 = vand.u32 4294901760, %v3267_v24  ;;  %v3296_v36 = vsub.f32 %v96_v8, %v3242_v11  ;;  %v3299_v37 = vand.u32 4294901760, %v3277_v28  ;;  %v3335_v52 = vld [vmem:[#allocation2 + $0x70] sm:$0xff]  ;;  %v3342_v57 = vld [vmem:[#allocation2 + $0x68] sm:$0xff]  ;;  %v3354_v62 = vld [vmem:[#allocation2 + $0x60] sm:$0xff]  ;;  %p3152_p2 = scmp.lt.s32.totalorder %s2544_s23, %s2544_s23 }
  0x2f   :  { %v4717_v35 = vand.u32 4294901760, %v3273_v26  ;;  %122 = vmatprep.subr.mxu0 %v3242_v11  ;;  %v224_v39 = vsub.f32 %v3254_v19, %v4720_v30  ;;  %v4715_v40 = vand.u32 4294901760, %v3287_v32  ;;  %v3309_v41 = vsub.f32 %v95_v9, %v3244_v12  ;;  %v3366_v7 = vld [vmem:[#allocation2 + $0x58] sm:$0xff]  ;;  %s3147_s24 = scalar_lea.vmem %s2544_s23, 128 }
  0x30   :  { %4862 = vst [vmem:[#allocation12_spill] sm:$0xff] %v3290_v33  ;;  %4863 = vst [vmem:[#allocation13_spill] sm:$0xff] %v3299_v37  ;;  %v3312_v42 = vand.u32 4294901760, %v3279_v29  ;;  %124 = vmatpush1.msra.mxu0 %v3244_v12  ;;  %v230_v43 = vsub.f32 %v3267_v24, %v4719_v34  ;;  %v4714_v45 = vand.u32 4294901760, %v3296_v36  ;;  %v3323_v46 = vsub.f32 %v94_v13, %v3247_v16  ;;  %v3467_v34 = vld [vmem:[#allocation2 + $0x20] sm:$0xff]  ;;  %p3148_p1 = scmp.ne.s32.totalorder %s2544_s23, %s3147_s24  ;;  %p3153_p3 = scmp.lt.s32.totalorder %s3147_s24, %s3147_s24 }
  0x31   :  { %v236_v44 = vsub.f32 %v3273_v26, %v4717_v35  ;;  %126 = vmatprep.subr.mxu0 %v3247_v16  ;;  %v225_v48 = vand.u32 4294901760, %v224_v39  ;;  %v242_v49 = vsub.f32 %v3287_v32, %v4715_v40  ;;  %v4712_v50 = vand.u32 4294901760, %v3309_v41  ;;  %v3457_v35 = vld [vmem:[#allocation2 + $0x28] sm:$0xff] }
  0x32   :  { %4864 = vst [vmem:[#allocation14_spill] sm:$0xff] %v3312_v42  ;;  %v3333_v51 = vand.u32 4294901760, %v3301_v38  ;;  %128 = vmatpush1.msra.mxu0 %v3249_v17  ;;  %v231_v53 = vand.u32 4294901760, %v230_v43  ;;  %v248_v55 = vsub.f32 %v3296_v36, %v4714_v45  ;;  %v4710_v56 = vand.u32 4294901760, %v3323_v46  ;;  %v3444_v45 = vld [vmem:[#allocation2 + $0x30] sm:$0xff]  ;;  %p3154_p4 = por %p3153_p3, %p3152_p2 }
  0x33   :  { %v237_v54 = vand.u32 4294901760, %v236_v44  ;;  %130 = vmatprep.subr.mxu0 %v3251_v18  ;;  %226 = vmatprep.subr.mxu1 %v225_v48  ;;  %v243_v58 = vand.u32 4294901760, %v242_v49  ;;  %v254_v59 = vsub.f32 %v3309_v41, %v4712_v50  ;;  %v3349_v60 = vsub.f32 %v93_v14, %v3249_v17 }
  0x34   :  { %4865 = vst [vmem:[#allocation15_spill] sm:$0xff] %v3333_v51  ;;  %v3352_v61 = vand.u32 4294901760, %v3325_v47  ;;  %132 = vmatpush1.msra.mxu0 %v3264_v23  ;;  %232 = vmatpush1.msra.mxu1 %v231_v53  ;;  %v249_v63 = vand.u32 4294901760, %v248_v55  ;;  %v260_v1 = vsub.f32 %v3323_v46, %v4710_v56  ;;  %v3361_v2 = vsub.f32 %v92_v15, %v3251_v18  ;;  %v3377_v15 = vld [vmem:[#allocation2 + $0x50] sm:$0xff]  ;;  %p3155_p5 = pnand %p3154_p4, %p3148_p1 }
  0x35   :  { %v3364_v3 = vand.u32 4294901760, %v3335_v52  ;;  %134 = vmatprep.subr.mxu0 %v3270_v25  ;;  %238 = vmatprep.subr.mxu1 %v237_v54  ;;  %v255_v8 = vand.u32 4294901760, %v254_v59  ;;  %v4709_v9 = vand.u32 4294901760, %v3349_v60  ;;  %v3372_v13 = vsub.f32 %v3256_v20, %v3264_v23 }
  0x36   :  { %4866 = vst [vmem:[#allocation16_spill] sm:$0xff] %v3352_v61  ;;  %v3375_v14 = vand.u32 4294901760, %v3342_v57  ;;  %136 = vmatpush1.msra.mxu0 %v3284_v31  ;;  %244 = vmatpush1.msra.mxu1 %v243_v58  ;;  %v261_v39 = vand.u32 4294901760, %v260_v1  ;;  %v4708_v43 = vand.u32 4294901760, %v3361_v2  ;;  %v3383_v44 = vsub.f32 %v3258_v21, %v3270_v25  ;;  %v3400_v21 = vld [vmem:[#allocation2 + $0x48] sm:$0xff] }
  0x37   :  { %4867 = vst [vmem:[#allocation17_spill] sm:$0xff] %v3364_v3  ;;  %v3386_v48 = vand.u32 4294901760, %v3354_v62  ;;  %138 = vmatprep.subr.mxu0 %v3290_v33  ;;  %250 = vmatprep.subr.mxu1 %v249_v63  ;;  %v266_v20 = vsub.f32 %v3349_v60, %v4709_v9  ;;  %v4711_v49 = vand.u32 4294901760, %v3372_v13  ;;  %v3395_v53 = vsub.f32 %v3260_v22, %v3284_v31  ;;  %v3423_v9 = vld [vmem:[#allocation2 + $0x40] sm:$0xff] }
  0x38   :  { %4868 = vst [vmem:[#allocation18_spill] sm:$0xff] %v3375_v14  ;;  %v3398_v54 = vand.u32 4294901760, %v3366_v7  ;;  %140 = vmatpush1.msra.mxu0 %v3299_v37  ;;  %256 = vmatpush1.msra.mxu1 %v255_v8  ;;  %v272_v55 = vsub.f32 %v3361_v2, %v4708_v43  ;;  %v4713_v58 = vand.u32 4294901760, %v3383_v44  ;;  %v3409_v59 = vsub.f32 %v3275_v27, %v3290_v33 }
  0x39   :  { %4869 = vst [vmem:[#allocation19_spill] sm:$0xff] %v3386_v48  ;;  %v3412_v22 = vand.u32 4294901760, %v3377_v15  ;;  %142 = vmatprep.subr.mxu0 %v3312_v42  ;;  %262 = vmatprep.subr.mxu1 %v261_v39  ;;  %v267_v63 = vand.u32 4294901760, %v266_v20  ;;  %v278_v1 = vsub.f32 %v3372_v13, %v4711_v49  ;;  %v4716_v8 = vand.u32 4294901760, %v3395_v53  ;;  %v3433_v49 = vld [vmem:[#allocation2 + $0x38] sm:$0xff] }
  0x3a   :  { %4870 = vst [vmem:[#allocation20_spill] sm:$0xff] %v3398_v54  ;;  %v3421_v43 = vsub.f32 %v3277_v28, %v3299_v37  ;;  %144 = vmatpush1.msra.mxu0 %v3333_v51  ;;  %v273_v27 = vand.u32 4294901760, %v272_v55  ;;  %v284_v39 = vsub.f32 %v3383_v44, %v4713_v58  ;;  %v4718_v20 = vand.u32 4294901760, %v3409_v59 }
  0x3b   :  { %4871 = vst [vmem:[#allocation21_spill] sm:$0xff] %v3412_v22  ;;  %v3431_v56 = vand.u32 4294901760, %v3400_v21  ;;  %268 = vmatpush1.msra.mxu1 %v267_v63  ;;  %146 = vmatprep.subr.mxu0 %v3352_v61  ;;  %v279_v28 = vand.u32 4294901760, %v278_v1  ;;  %v290_v50 = vsub.f32 %v3395_v53, %v4716_v8  ;;  %v3442_v58 = vsub.f32 %v3279_v29, %v3312_v42 }
  0x3c   :  { %v4721_v55 = vand.u32 4294901760, %v3421_v43  ;;  %274 = vmatprep.subr.mxu1 %v273_v27  ;;  %148 = vmatpush1.msra.mxu0 %v3364_v3  ;;  %v285_v40 = vand.u32 4294901760, %v284_v39  ;;  %v296_v63 = vsub.f32 %v3409_v59, %v4718_v20  ;;  %v3451_v1 = vand.u32 4294901760, %v3423_v9 }
  0x3d   :  { %4872 = vst [vmem:[#allocation22_spill] sm:$0xff] %v3431_v56  ;;  %v3455_v8 = vsub.f32 %v3301_v38, %v3333_v51  ;;  %280 = vmatpush1.msra.mxu1 %v279_v28  ;;  %150 = vmatprep.subr.mxu0 %v3375_v14  ;;  %v291_v29 = vand.u32 4294901760, %v290_v50  ;;  %v4726_v39 = vand.u32 4294901760, %v3442_v58  ;;  %v3465_v20 = vand.u32 4294901760, %v3433_v49 }
  0x3e   :  { %4873 = vst [vmem:[#allocation23_spill] sm:$0xff] %v3451_v1  ;;  %v302_v27 = vsub.f32 %v3421_v43, %v4721_v55  ;;  %286 = vmatprep.subr.mxu1 %v285_v40  ;;  %152 = vmatpush1.msra.mxu0 %v3386_v48  ;;  %v297_v38 = vand.u32 4294901760, %v296_v63  ;;  %v3473_v50 = vsub.f32 %v3325_v47, %v3352_v61  ;;  %v3476_v30 = vand.u32 4294901760, %v3444_v45  ;;  %v3478_v55 = vld [vmem:[#allocation2 + $0x18] sm:$0xff] }
  0x3f   :  { %v4729_v28 = vand.u32 4294901760, %v3455_v8  ;;  %292 = vmatpush1.msra.mxu1 %v291_v29  ;;  %154 = vmatprep.subr.mxu0 %v3398_v54  ;;  %v308_v40 = vsub.f32 %v3442_v58, %v4726_v39  ;;  %v3486_v63 = vsub.f32 %v3335_v52, %v3364_v3  ;;  %v3489_v47 = vand.u32 4294901760, %v3457_v35  ;;  %v3503_v52 = vld [vmem:[#allocation2 + $0x10] sm:$0xff] }
  0x40   :  { %4874 = vst [vmem:[#allocation24_spill] sm:$0xff] %v3476_v30  ;;  %v303_v0 = vand.u32 4294901760, %v302_v27  ;;  %298 = vmatprep.subr.mxu1 %v297_v38  ;;  %156 = vmatpush1.msra.mxu0 %v3412_v22  ;;  %v3498_v61 = vsub.f32 %v3342_v57, %v3375_v14  ;;  %v3501_v39 = vand.u32 4294901760, %v3467_v34  ;;  %v3512_v27 = vand.u32 4294901760, %v3478_v55  ;;  %v3514_v57 = vld [vmem:[#allocation2 + $0x8] sm:$0xff] }
  0x41   :  { %4875 = vst [vmem:[#allocation25_spill] sm:$0xff] %v3489_v47  ;;  %v314_v29 = vsub.f32 %v3455_v8, %v4729_v28  ;;  %158 = vmatprep.subr.mxu0 %v3431_v56  ;;  %v309_v38 = vand.u32 4294901760, %v308_v40  ;;  %v3509_v28 = vsub.f32 %v3354_v62, %v3386_v48  ;;  %v4877_v51 = vand.u32 4294901760, %v3473_v50  ;;  %v3537_v40 = vld [vmem:[#allocation2] sm:$0xff] }
  0x42   :  { %4876 = vst [vmem:[#allocation26_spill] sm:$0xff] %v3501_v39  ;;  %304 = vmatpush1.msra.mxu1 %v303_v0  ;;  %160 = vmatpush1.msra.mxu0 %v3451_v1  ;;  %v3523_v3 = vsub.f32 %v3366_v7, %v3398_v54  ;;  %v4879_v62 = vand.u32 4294901760, %v3486_v63  ;;  %v3545_v42 = vand.u32 4294901760, %v3514_v57 }
  0x43   :  { %v315_v14 = vand.u32 4294901760, %v314_v29  ;;  %v320_v0 = vsub.f32 %v3473_v50, %v4877_v51  ;;  %310 = vmatprep.subr.mxu1 %v309_v38  ;;  %162 = vmatprep.subr.mxu0 %v3465_v20  ;;  %v3531_v29 = vand.u32 4294901760, %v3503_v52  ;;  %v3535_v51 = vsub.f32 %v3377_v15, %v3412_v22 }
  0x44   :  { %4878 = vst [vmem:[#allocation27_spill] sm:$0xff] %v3523_v3  ;;  %v326_v48 = vsub.f32 %v3486_v63, %v4879_v62  ;;  %164 = vmatpush1.msra.mxu0 %v3476_v30  ;;  %v4881_v38 = vand.u32 4294901760, %v3498_v61  ;;  %v4882_v15 = vand.u32 4294901760, %v3509_v28 }
  0x45   :  { %4880 = vst [vmem:[#allocation28_spill] sm:$0xff] %v3531_v29  ;;  %316 = vmatpush1.msra.mxu1 %v315_v14  ;;  %v321_v7 = vand.u32 4294901760, %v320_v0  ;;  %166 = vmatprep.subr.mxu0 %v3489_v47  ;;  %v3554_v0 = vsub.f32 %v3400_v21, %v3431_v56  ;;  %v3568_v14 = vsub.f32 %v3423_v9, %v3451_v1 }
  0x46   :  { %v332_v54 = vsub.f32 %v3498_v61, %v4881_v38  ;;  %v327_v37 = vand.u32 4294901760, %v326_v48  ;;  %v338_v22 = vsub.f32 %v3509_v28, %v4882_v15  ;;  %v68_v38 = vld [vmem:[%s4700_s0] sm:$0xff]  ;;  %168 = vmatpush1.msra.mxu0 %v3501_v39  ;;  %v4883_v48 = vand.u32 4294901760, %v3523_v3 }
  0x47   :  { %322 = vmatprep.subr.mxu1 %v321_v7  ;;  %v3564_v15 = vand.u32 4294901760, %v3537_v40  ;;  %170 = vmatprep.subr.mxu0 %v3512_v27  ;;  %v4884_v7 = vand.u32 4294901760, %v3535_v51  ;;  %v4750_v56 = vand.u32 4294901760, %v3554_v0  ;;  %v4753_v9 = vand.u32 4294901760, %v3568_v14 }
  0x48   :  { %v333_v62 = vand.u32 4294901760, %v332_v54  ;;  %v344_v33 = vsub.f32 %v3523_v3, %v4883_v48  ;;  %328 = vmatpush1.msra.mxu1 %v327_v37  ;;  %v339_v21 = vand.u32 4294901760, %v338_v22  ;;  %v3577_v48 = vsub.f32 %v3433_v49, %v3465_v20  ;;  %172 = vmatpush1.msra.mxu0 %v3531_v29 }
  0x49   :  { %v350_v54 = vsub.f32 %v3535_v51, %v4884_v7  ;;  %v3581_v37 = vand.u32 4294901760, %v68_v38  ;;  %v3585_v22 = vsub.f32 %v3444_v45, %v3476_v30  ;;  %174 = vmatprep.subr.mxu0 %v3545_v42  ;;  %v356_v49 = vsub.f32 %v3554_v0, %v4750_v56 }
  0x4a   :  { %334 = vmatprep.subr.mxu1 %v333_v62  ;;  %v345_v3 = vand.u32 4294901760, %v344_v33  ;;  %v3594_v62 = vsub.f32 %v3457_v35, %v3489_v47  ;;  %176 = vmatpush1.msra.mxu0 %v3564_v15  ;;  %v362_v45 = vsub.f32 %v3568_v14, %v4753_v9  ;;  %v3606_v56 = vsub.f32 %v3467_v34, %v3501_v39 }
  0x4b   :  { %4885 = vst [vmem:[#allocation29_spill] sm:$0xff] %v3581_v37  ;;  %340 = vmatpush1.msra.mxu1 %v339_v21  ;;  %v351_v7 = vand.u32 4294901760, %v350_v54  ;;  %v3601_v21 = vsub.f32 %v68_v38, %v3581_v37  ;;  %v357_v33 = vand.u32 4294901760, %v356_v49  ;;  %v4886_v35 = vand.u32 4294901760, %v3577_v48  ;;  %455 = vmatprep.subr.mxu0 %v3254_v19 }
  0x4c   :  { %346 = vmatprep.subr.mxu1 %v345_v3  ;;  %v4758_v47 = vand.u32 4294901760, %v3594_v62  ;;  %v3615_v38 = vsub.f32 %v3478_v55, %v3512_v27  ;;  %v363_v9 = vand.u32 4294901760, %v362_v45  ;;  %v4887_v34 = vand.u32 4294901760, %v3585_v22 }
  0x4d   :  { %352 = vmatpush1.msra.mxu1 %v351_v7  ;;  %v368_v3 = vsub.f32 %v3577_v48, %v4886_v35  ;;  %v4759_v54 = vand.u32 4294901760, %v3601_v21  ;;  %v4762_v49 = vand.u32 4294901760, %v3606_v56  ;;  %v3628_v55 = vsub.f32 %v3503_v52, %v3531_v29 }
  0x4e   :  { %v374_v7 = vsub.f32 %v3585_v22, %v4887_v34  ;;  %358 = vmatprep.subr.mxu1 %v357_v33  ;;  %v380_v35 = vsub.f32 %v3594_v62, %v4758_v47  ;;  %v4766_v30 = vand.u32 4294901760, %v3615_v38 }
  0x4f   :  { %v369_v39 = vand.u32 4294901760, %v368_v3  ;;  %4888 = vst [vmem:[#allocation30_spill] sm:$0xff] %v3628_v55  ;;  %364 = vmatpush1.msra.mxu1 %v363_v9  ;;  %v213_v45 = vsub.f32 %v3601_v21, %v4759_v54  ;;  %v386_v33 = vsub.f32 %v3606_v56, %v4762_v49  ;;  %v3638_v3 = vsub.f32 %v3514_v57, %v3545_v42 }
  0x50   :  { %v375_v34 = vand.u32 4294901760, %v374_v7  ;;  %v381_v47 = vand.u32 4294901760, %v380_v35  ;;  %v392_v52 = vsub.f32 %v3615_v38, %v4766_v30  ;;  %v4765_v9 = vand.u32 4294901760, %v3628_v55 }
  0x51   :  { %370 = vmatprep.subr.mxu1 %v369_v39  ;;  %v3646_v54 = vsub.f32 %v3537_v40, %v3564_v15  ;;  %v214_v7 = vand.u32 4294901760, %v213_v45  ;;  %v387_v29 = vand.u32 4294901760, %v386_v33  ;;  %v4764_v49 = vand.u32 4294901760, %v3638_v3 }
  0x52   :  { %376 = vmatpush1.msra.mxu1 %v375_v34  ;;  %v393_v57 = vand.u32 4294901760, %v392_v52  ;;  %v398_v39 = vsub.f32 %v3628_v55, %v4765_v9  ;;  %v4890_v33 = vmov 0.0   ;;  %v4891_v52 = vld [vmem:[#allocation12_spill] sm:$0xff]  ;;  %v4902_v9 = vld [vmem:[#allocation22_spill] sm:$0xff]  ;;  %v4903_v30 = vand.u32 4294901760, %v3254_v19 }
  0x53   :  { %4889 = vst [vmem:[#allocation31_spill] sm:$0xff] %v3646_v54  ;;  %382 = vmatprep.subr.mxu1 %v381_v47  ;;  %v4763_v35 = vand.u32 4294901760, %v3646_v54  ;;  %215 = vmatmul.mubr.f32.vlgmr.msra.gmra.mxu0 %v214_v7  ;;  %v404_v40 = vsub.f32 %v3638_v3, %v4764_v49  ;;  %v4892_v7 = vld [vmem:[#allocation27_spill] sm:$0xff]  ;;  %v4901_v49 = vld [vmem:[#allocation21_spill] sm:$0xff]  ;;  %v4910_v19 = vand.u32 4294901760, %v3296_v36 }
  0x54   :  { %388 = vmatpush1.msra.mxu1 %v387_v29  ;;  %458 = vmatpush1.msra.mxu0 %v3267_v24  ;;  %v399_v45 = vand.u32 4294901760, %v398_v39  ;;  %v4894_v39 = vld [vmem:[#allocation14_spill] sm:$0xff] }
  0x55   :  { %394 = vmatprep.subr.mxu1 %v393_v57  ;;  %v410_v47 = vsub.f32 %v3646_v54, %v4763_v35  ;;  %461 = vmatprep.subr.mxu0 %v3273_v26  ;;  %v405_v34 = vand.u32 4294901760, %v404_v40  ;;  %v4893_v57 = vld [vmem:[#allocation13_spill] sm:$0xff]  ;;  %v4895_v40 = vld [vmem:[#allocation15_spill] sm:$0xff]  ;;  %v4900_v35 = vld [vmem:[#allocation20_spill] sm:$0xff] }
  0x56   :  { %581 = vmatprep.mubr.f32.mxu0 %v4890_v33  ;;  %464 = vmatpush1.msra.mxu0 %v3287_v32 }
  0x57   :  { %400 = vmatpush1.msra.mxu1 %v399_v45  ;;  %v411_v29 = vand.u32 4294901760, %v410_v47  ;;  %467 = vmatprep.subr.mxu0 %v3296_v36  ;;  %v4896_v45 = vld [vmem:[#allocation16_spill] sm:$0xff]  ;;  %v4897_v47 = vld [vmem:[#allocation17_spill] sm:$0xff]  ;;  %v4915_v36 = vand.u32 4294901760, %v3601_v21 }
  0x58   :  { %406 = vmatprep.subr.mxu1 %v405_v34  ;;  %470 = vmatpush1.msra.mxu0 %v3309_v41  ;;  %v4898_v34 = vld [vmem:[#allocation18_spill] sm:$0xff] }
  0x59   :  { %412 = vmatpush1.msra.mxu1 %v411_v29  ;;  %473 = vmatprep.subr.mxu0 %v3323_v46  ;;  %v4899_v29 = vld [vmem:[#allocation19_spill] sm:$0xff] }
  0x5a   :  { %447 = vmatmul.mubr.f32.vlgmr.msra.gmra.mxu1 %v3581_v37  ;;  %476 = vmatpush1.msra.mxu0 %v3349_v60  ;;  %v4904_v37 = vld [vmem:[#allocation24_spill] sm:$0xff] }
  0x5b   :  { %591 = vmatprep.subr.mxu1 %v3234_v4  ;;  %479 = vmatprep.subr.mxu0 %v3361_v2 }
  0x5c   :  { %593 = vmatpush1.msra.mxu1 %v3236_v5  ;;  %482 = vmatpush1.msra.mxu0 %v3372_v13 }
  0x5d   :  { %595 = vmatprep.subr.mxu1 %v3238_v6  ;;  %485 = vmatprep.subr.mxu0 %v3383_v44 }
  0x5e   :  { %597 = vmatpush1.msra.mxu1 %v3240_v10  ;;  %488 = vmatpush1.msra.mxu0 %v3395_v53 }
  0x5f   :  { %599 = vmatprep.subr.mxu1 %v3242_v11  ;;  %491 = vmatprep.subr.mxu0 %v3409_v59 }
  0x60   :  { %601 = vmatpush1.msra.mxu1 %v3244_v12  ;;  %494 = vmatpush1.msra.mxu0 %v3421_v43 }
  0x61   :  { %603 = vmatprep.subr.mxu1 %v3247_v16  ;;  %497 = vmatprep.subr.mxu0 %v3442_v58 }
  0x62   :  { %605 = vmatpush1.msra.mxu1 %v3249_v17  ;;  %500 = vmatpush1.msra.mxu0 %v3455_v8 }
  0x63   :  { %607 = vmatprep.subr.mxu1 %v3251_v18  ;;  %503 = vmatprep.subr.mxu0 %v3473_v50 }
  0x64   :  { %609 = vmatpush1.msra.mxu1 %v3264_v23  ;;  %506 = vmatpush1.msra.mxu0 %v3486_v63 }
  0x65   :  { %611 = vmatprep.subr.mxu1 %v3270_v25  ;;  %509 = vmatprep.subr.mxu0 %v3498_v61 }
  0x66   :  { %613 = vmatpush1.msra.mxu1 %v3284_v31  ;;  %512 = vmatpush1.msra.mxu0 %v3509_v28 }
  0x67   :  { %615 = vmatprep.subr.mxu1 %v4891_v52  ;;  %515 = vmatprep.subr.mxu0 %v4892_v7 }
  0x68   :  { %617 = vmatpush1.msra.mxu1 %v4893_v57  ;;  %518 = vmatpush1.msra.mxu0 %v3535_v51 }
  0x69   :  { %619 = vmatprep.subr.mxu1 %v4894_v39  ;;  %521 = vmatprep.subr.mxu0 %v3554_v0 }
  0x6a   :  { %621 = vmatpush1.msra.mxu1 %v4895_v40  ;;  %524 = vmatpush1.msra.mxu0 %v3568_v14 }
  0x6b   :  { %623 = vmatprep.subr.mxu1 %v4896_v45  ;;  %527 = vmatprep.subr.mxu0 %v3577_v48 }
  0x6c   :  { %625 = vmatpush1.msra.mxu1 %v4897_v47  ;;  %530 = vmatpush1.msra.mxu0 %v3585_v22 }
  0x6d   :  { %627 = vmatprep.subr.mxu1 %v4898_v34  ;;  %533 = vmatprep.subr.mxu0 %v3594_v62 }
  0x6e   :  { %629 = vmatpush1.msra.mxu1 %v4899_v29  ;;  %536 = vmatpush1.msra.mxu0 %v3606_v56 }
  0x6f   :  { %631 = vmatprep.subr.mxu1 %v4900_v35  ;;  %539 = vmatprep.subr.mxu0 %v3615_v38 }
  0x70   :  { %633 = vmatpush1.msra.mxu1 %v4901_v49  ;;  %542 = vmatpush1.msra.mxu0 %v3628_v55  ;;  %v4905_v49 = vand.u32 4294901760, %v3267_v24  ;;  %v4906_v55 = vld [vmem:[#allocation25_spill] sm:$0xff]  ;;  %v4912_v24 = vand.u32 4294901760, %v3309_v41  ;;  %v4917_v41 = vand.u32 4294901760, %v3372_v13  ;;  %v4934_v13 = vand.u32 4294901760, %v3594_v62  ;;  %v999_v62 = vld [vmem:[#allocation5 + $0xe8] sm:$0xff] }
  0x71   :  { %635 = vmatprep.subr.mxu1 %v4902_v9  ;;  %545 = vmatprep.subr.mxu0 %v3638_v3  ;;  %v4907_v9 = vand.u32 4294901760, %v3273_v26  ;;  %v4913_v26 = vand.u32 4294901760, %v3323_v46  ;;  %v4918_v46 = vand.u32 4294901760, %v3383_v44  ;;  %v4936_v44 = vand.u32 4294901760, %v3615_v38 }
  0x72   :  { %637 = vmatpush1.msra.mxu1 %v3451_v1  ;;  %548 = vmatpush1.msra.mxu0 %v3646_v54  ;;  %v4908_v1 = vld [vmem:[#allocation26_spill] sm:$0xff]  ;;  %v4909_v54 = vand.u32 4294901760, %v3287_v32  ;;  %v4914_v32 = vand.u32 4294901760, %v3349_v60  ;;  %v4919_v60 = vand.u32 4294901760, %v3395_v53  ;;  %v3843_v38 = vand.u32 4294901760, %v999_v62 }
  0x73   :  { %639 = vmatprep.subr.mxu1 %v3465_v20  ;;  %584 = vmatmul.mubr.f32.vlgmr.msra.gmra.mxu0 %v3601_v21  ;;  %v4937_v53 = vld [vmem:[#allocation30_spill] sm:$0xff]  ;;  %v983_v21 = vld [vmem:[#allocation5 + $0x68] sm:$0xff] }
  0x74   :  { %699 = vmatprep.subr.mxu0 %v4903_v30  ;;  %641 = vmatpush1.msra.mxu1 %v4904_v37  ;;  %v4911_v30 = vld [vmem:[#allocation28_spill] sm:$0xff] }
  0x75   :  { %703 = vmatpush1.msra.mxu0 %v4905_v49  ;;  %643 = vmatprep.subr.mxu1 %v4906_v55  ;;  %v3845_v49 = vand.u32 4294901760, %v983_v21 }
  0x76   :  { %707 = vmatprep.subr.mxu0 %v4907_v9  ;;  %645 = vmatpush1.msra.mxu1 %v4908_v1 }
  0x77   :  { %711 = vmatpush1.msra.mxu0 %v4909_v54  ;;  %647 = vmatprep.subr.mxu1 %v3512_v27  ;;  %v4916_v54 = vand.u32 4294901760, %v3361_v2  ;;  %v4920_v2 = vand.u32 4294901760, %v3409_v59  ;;  %v4939_v59 = vld [vmem:[#allocation21_spill] sm:$0xff] }
  0x78   :  { %715 = vmatprep.subr.mxu0 %v4910_v19  ;;  %649 = vmatpush1.msra.mxu1 %v4911_v30 }
  0x79   :  { %719 = vmatpush1.msra.mxu0 %v4912_v24  ;;  %651 = vmatprep.subr.mxu1 %v3545_v42 }
  0x7a   :  { %723 = vmatprep.subr.mxu0 %v4913_v26  ;;  %653 = vmatpush1.msra.mxu1 %v3564_v15 }
  0x7b   :  { %686 = vmatprep.mubr.f32.mxu1 %v4890_v33  ;;  %727 = vmatpush1.msra.mxu0 %v4914_v32 }
  0x7c   :  { %690 = vmatmul.mubr.f32.vlgmr.msra.gmra.mxu1 %v4915_v36  ;;  %731 = vmatprep.subr.mxu0 %v4916_v54  ;;  %v997_v36 = vld [vmem:[#allocation5 + $0xd8] sm:$0xff] }
  0x7d   :  { %865 = vmatprep.subr.mxu1 %v3234_v4  ;;  %735 = vmatpush1.msra.mxu0 %v4917_v41  ;;  %v4921_v4 = vand.u32 4294901760, %v3421_v43  ;;  %v4935_v43 = vand.u32 4294901760, %v3606_v56 }
  0x7e   :  { %867 = vmatpush1.msra.mxu1 %v3236_v5  ;;  %739 = vmatprep.subr.mxu0 %v4918_v46  ;;  %v4922_v5 = vand.u32 4294901760, %v3442_v58  ;;  %v4938_v58 = vand.u32 4294901760, %v4937_v53  ;;  %v994_v53 = vld [vmem:[#allocation5 + $0xc0] sm:$0xff] }
  0x7f   :  { %869 = vmatprep.subr.mxu1 %v3238_v6  ;;  %743 = vmatpush1.msra.mxu0 %v4919_v60  ;;  %v4923_v6 = vand.u32 4294901760, %v3455_v8  ;;  %v4940_v8 = vand.u32 4294901760, %v3638_v3  ;;  %v982_v3 = vld [vmem:[#allocation5 + $0x60] sm:$0xff] }
  0x80   :  { %871 = vmatpush1.msra.mxu1 %v3240_v10  ;;  %747 = vmatprep.subr.mxu0 %v4920_v2  ;;  %v4924_v10 = vand.u32 4294901760, %v3473_v50  ;;  %v4942_v50 = vld [vmem:[#allocation31_spill] sm:$0xff]  ;;  %v981_v2 = vld [vmem:[#allocation5 + $0x58] sm:$0xff] }
  0x81   :  { %873 = vmatprep.subr.mxu1 %v3242_v11  ;;  %751 = vmatpush1.msra.mxu0 %v4921_v4  ;;  %v4925_v11 = vand.u32 4294901760, %v3486_v63  ;;  %v4943_v56 = vand.u32 4294901760, %v4942_v50  ;;  %v4944_v63 = vld [vmem:[#allocation23_spill] sm:$0xff] }
  0x82   :  { %875 = vmatpush1.msra.mxu1 %v3244_v12  ;;  %755 = vmatprep.subr.mxu0 %v4922_v5  ;;  %v4926_v12 = vand.u32 4294901760, %v3498_v61  ;;  %v4933_v61 = vand.u32 4294901760, %v3585_v22 }
  0x83   :  { %877 = vmatprep.subr.mxu1 %v3247_v16  ;;  %759 = vmatpush1.msra.mxu0 %v4923_v6  ;;  %v4927_v16 = vand.u32 4294901760, %v3509_v28  ;;  %v4941_v28 = vld [vmem:[#allocation22_spill] sm:$0xff] }
  0x84   :  { %879 = vmatpush1.msra.mxu1 %v3249_v17  ;;  %763 = vmatprep.subr.mxu0 %v4924_v10  ;;  %v4928_v17 = vand.u32 4294901760, %v4892_v7  ;;  %v3854_v7 = vand.u32 4294901760, %v982_v3 }
  0x85   :  { %881 = vmatprep.subr.mxu1 %v3251_v18  ;;  %767 = vmatpush1.msra.mxu0 %v4925_v11  ;;  %v4929_v18 = vand.u32 4294901760, %v3535_v51  ;;  %v4945_v51 = vld [vmem:[#allocation29_spill] sm:$0xff] }
  0x86   :  { %883 = vmatpush1.msra.mxu1 %v3264_v23  ;;  %771 = vmatprep.subr.mxu0 %v4926_v12  ;;  %v4930_v23 = vand.u32 4294901760, %v3554_v0  ;;  %v985_v0 = vld [vmem:[#allocation5 + $0x78] sm:$0xff]  ;;  %v3876_v19 = vsub.f32 %v982_v3, %v3854_v7  ;;  %v996_v11 = vld [vmem:[#allocation5 + $0xd0] sm:$0xff] }
  0x87   :  { %885 = vmatprep.subr.mxu1 %v3270_v25  ;;  %775 = vmatpush1.msra.mxu0 %v4927_v16  ;;  %v4931_v25 = vand.u32 4294901760, %v3568_v14  ;;  %v1001_v14 = vld [vmem:[#allocation5 + $0xf8] sm:$0xff] }
  0x88   :  { %887 = vmatpush1.msra.mxu1 %v3284_v31  ;;  %779 = vmatprep.subr.mxu0 %v4928_v17  ;;  %v4932_v31 = vand.u32 4294901760, %v3577_v48  ;;  %v3830_v48 = vand.u32 4294901760, %v985_v0  ;;  %v4780_v60 = vand.u32 4294901760, %v3876_v19 }
  0x89   :  { %889 = vmatprep.subr.mxu1 %v4891_v52  ;;  %783 = vmatpush1.msra.mxu0 %v4929_v18  ;;  %v3908_v18 = vand.u32 4294901760, %v997_v36 }
  0x8a   :  { %891 = vmatpush1.msra.mxu1 %v4893_v57  ;;  %787 = vmatprep.subr.mxu0 %v4930_v23  ;;  %v1146_v17 = vsub.f32 %v3876_v19, %v4780_v60  ;;  %v980_v23 = vld [vmem:[#allocation5 + $0x50] sm:$0xff] }
  0x8b   :  { %893 = vmatprep.subr.mxu1 %v4894_v39  ;;  %791 = vmatpush1.msra.mxu0 %v4931_v25  ;;  %v995_v25 = vld [vmem:[#allocation5 + $0xc8] sm:$0xff] }
  0x8c   :  { %895 = vmatpush1.msra.mxu1 %v4895_v40  ;;  %795 = vmatprep.subr.mxu0 %v4932_v31  ;;  %v3862_v40 = vsub.f32 %v999_v62, %v3843_v38  ;;  %v979_v31 = vld [vmem:[#allocation5 + $0x48] sm:$0xff] }
  0x8d   :  { %897 = vmatprep.subr.mxu1 %v4896_v45  ;;  %799 = vmatpush1.msra.mxu0 %v4933_v61  ;;  %v3865_v45 = vsub.f32 %v983_v21, %v3845_v49 }
  0x8e   :  { %899 = vmatpush1.msra.mxu1 %v4897_v47  ;;  %803 = vmatprep.subr.mxu0 %v4934_v13  ;;  %v4784_v26 = vand.u32 4294901760, %v3862_v40 }
  0x8f   :  { %901 = vmatprep.subr.mxu1 %v4898_v34  ;;  %807 = vmatpush1.msra.mxu0 %v4935_v43  ;;  %v4783_v32 = vand.u32 4294901760, %v3865_v45 }
  0x90   :  { %903 = vmatpush1.msra.mxu1 %v4899_v29  ;;  %811 = vmatprep.subr.mxu0 %v4936_v44  ;;  %v1251_v6 = vsub.f32 %v3862_v40, %v4784_v26  ;;  %v3910_v44 = vand.u32 4294901760, %v981_v2 }
  0x91   :  { %905 = vmatprep.subr.mxu1 %v4900_v35  ;;  %815 = vmatpush1.msra.mxu0 %v4938_v58  ;;  %v1139_v10 = vsub.f32 %v3865_v45, %v4783_v32  ;;  %v989_v32 = vld [vmem:[#allocation5 + $0x98] sm:$0xff] }
  0x92   :  { %907 = vmatpush1.msra.mxu1 %v4939_v59  ;;  %819 = vmatprep.subr.mxu0 %v4940_v8  ;;  %v1252_v13 = vand.u32 4294901760, %v1251_v6  ;;  %v1147_v59 = vand.u32 4294901760, %v1146_v17  ;;  %v3913_v8 = vsub.f32 %v997_v36, %v3908_v18  ;;  %v3919_v50 = vsub.f32 %v981_v2, %v3910_v44  ;;  %v993_v6 = vld [vmem:[#allocation5 + $0xb8] sm:$0xff] }
  0x93   :  { %909 = vmatprep.subr.mxu1 %v4941_v28  ;;  %823 = vmatpush1.msra.mxu0 %v4943_v56  ;;  %v1140_v43 = vand.u32 4294901760, %v1139_v10  ;;  %v3915_v28 = vand.u32 4294901760, %v996_v11  ;;  %v3921_v56 = vand.u32 4294901760, %v980_v23  ;;  %v977_v17 = vld [vmem:[#allocation5 + $0x38] sm:$0xff] }
  0x94   :  { %856 = vmatprep.mubr.f32.mxu0 %v4890_v33  ;;  %911 = vmatpush1.msra.mxu1 %v4944_v63  ;;  %v3923_v63 = vand.u32 4294901760, %v995_v25  ;;  %v4776_v62 = vand.u32 4294901760, %v3919_v50 }
  0x95   :  { %858 = vmatmul.mubr.f32.vlgmr.msra.gmra.mxu0 %v4945_v51  ;;  %913 = vmatprep.subr.mxu1 %v3465_v20  ;;  %v3828_v20 = vand.u32 4294901760, %v1001_v14  ;;  %v3937_v21 = vsub.f32 %v980_v23, %v3921_v56 }
  0x96   :  { %960 = vmatprep.mubr.f32.mxu1 %v4890_v33  ;;  %915 = vmatpush1.msra.mxu1 %v4904_v37  ;;  %v1000_v37 = vld [vmem:[#allocation5 + $0xf0] sm:$0xff] }
  0x97   :  { %917 = vmatprep.subr.mxu1 %v4906_v55  ;;  %4946 = vst [vmem:[#allocation12_spill] sm:$0xff] %v3828_v20  ;;  %v3833_v22 = vsub.f32 %v1001_v14, %v3828_v20  ;;  %2555 = vmatprep.subr.mxu0 %v3828_v20  ;;  %v998_v55 = vld [vmem:[#allocation5 + $0xe0] sm:$0xff]  ;;  %v4778_v14 = vand.u32 4294901760, %v3913_v8  ;;  %v4773_v2 = vand.u32 4294901760, %v3937_v21 }
  0x98   :  { %919 = vmatpush1.msra.mxu1 %v4908_v1  ;;  %v3835_v1 = vand.u32 4294901760, %v1000_v37  ;;  %2556 = vmatpush3.msra.mxu0 %v3830_v48  ;;  %v3852_v52 = vand.u32 4294901760, %v998_v55 }
  0x99   :  { %921 = vmatprep.subr.mxu1 %v3512_v27  ;;  %4947 = vst [vmem:[#allocation27_spill] sm:$0xff] %v3833_v22  ;;  %v984_v27 = vld [vmem:[#allocation5 + $0x70] sm:$0xff]  ;;  %v4790_v9 = vand.u32 4294901760, %v3833_v22 }
  0x9a   :  { %923 = vmatpush1.msra.mxu1 %v4911_v30  ;;  %v3850_v35 = vsub.f32 %v1000_v37, %v3835_v1  ;;  %2557 = vmatprep.subr.mxu0 %v3835_v1  ;;  %v3873_v29 = vsub.f32 %v998_v55, %v3852_v52  ;;  %v3932_v37 = vand.u32 4294901760, %v994_v53  ;;  %v3940_v55 = vsub.f32 %v995_v25, %v3923_v63 }
  0x9b   :  { %925 = vmatprep.subr.mxu1 %v3545_v42  ;;  %v3839_v42 = vsub.f32 %v985_v0, %v3830_v48  ;;  %v1237_v47 = vsub.f32 %v3833_v22, %v4790_v9  ;;  %v3930_v0 = vsub.f32 %v996_v11, %v3915_v28  ;;  %v1160_v25 = vsub.f32 %v3937_v21, %v4773_v2  ;;  %v988_v9 = vld [vmem:[#allocation5 + $0x90] sm:$0xff] }
  0x9c   :  { %927 = vmatpush1.msra.mxu1 %v3564_v15  ;;  %v3841_v15 = vand.u32 4294901760, %v984_v27  ;;  %v4787_v34 = vand.u32 4294901760, %v3850_v35  ;;  %v4781_v46 = vand.u32 4294901760, %v3873_v29  ;;  %v3951_v36 = vsub.f32 %v994_v53, %v3932_v37 }
  0x9d   :  { %962 = vmatmul.mubr.f32.vlgmr.msra.gmra.mxu1 %v4945_v51  ;;  %v4788_v57 = vand.u32 4294901760, %v3839_v42  ;;  %v1238_v54 = vand.u32 4294901760, %v1237_v47  ;;  %v3925_v51 = vand.u32 4294901760, %v979_v31  ;;  %v1265_v47 = vsub.f32 %v3913_v8, %v4778_v14 }
  0x9e   :  { %v3859_v39 = vsub.f32 %v984_v27, %v3841_v15  ;;  %2558 = vmatpush3.msra.mxu0 %v3841_v15  ;;  %v1244_v41 = vsub.f32 %v3850_v35, %v4787_v34  ;;  %v1258_v16 = vsub.f32 %v3873_v29, %v4781_v46  ;;  %v978_v27 = vld [vmem:[#allocation5 + $0x40] sm:$0xff] }
  0x9f   :  { %2559 = vmatprep.subr.mxu0 %v3843_v38  ;;  %v1125_v30 = vsub.f32 %v3839_v42, %v4788_v57  ;;  %2590 = vmatprep.subr.mxu1 %v1238_v54  ;;  %v3943_v3 = vsub.f32 %v979_v31, %v3925_v51  ;;  %v3953_v54 = vand.u32 4294901760, %v978_v27  ;;  %v1266_v10 = vand.u32 4294901760, %v1265_v47  ;;  %v991_v47 = vld [vmem:[#allocation5 + $0xa8] sm:$0xff] }
  0xa0   :  { %v4785_v24 = vand.u32 4294901760, %v3859_v39  ;;  %2560 = vmatpush3.msra.mxu0 %v3845_v49  ;;  %v1245_v12 = vand.u32 4294901760, %v1244_v41  ;;  %v1259_v58 = vand.u32 4294901760, %v1258_v16  ;;  %v1153_v41 = vsub.f32 %v3919_v50, %v4776_v62  ;;  %v990_v62 = vld [vmem:[#allocation5 + $0xa0] sm:$0xff] }
  0xa1   :  { %2561 = vmatprep.subr.mxu0 %v3852_v52  ;;  %v1126_v4 = vand.u32 4294901760, %v1125_v30  ;;  %v4775_v30 = vand.u32 4294901760, %v3930_v0  ;;  %v3968_v16 = vsub.f32 %v978_v27, %v3953_v54  ;;  %v976_v27 = vld [vmem:[#allocation5 + $0x30] sm:$0xff] }
  0xa2   :  { %v1132_v5 = vsub.f32 %v3859_v39, %v4785_v24  ;;  %2562 = vmatpush3.msra.mxu0 %v3854_v7  ;;  %v1154_v23 = vand.u32 4294901760, %v1153_v41  ;;  %v975_v41 = vld [vmem:[#allocation5 + $0x28] sm:$0xff] }
  0xa3   :  { %2591 = vmatpush3.msra.mxu1 %v1126_v4  ;;  %2563 = vmatprep.subr.mxu0 %v3908_v18  ;;  %v4772_v4 = vand.u32 4294901760, %v3940_v55  ;;  %v1272_v11 = vsub.f32 %v3930_v0, %v4775_v30  ;;  %v3987_v30 = vand.u32 4294901760, %v977_v17 }
  0xa4   :  { %v1133_v61 = vand.u32 4294901760, %v1132_v5  ;;  %2592 = vmatprep.subr.mxu1 %v1245_v12  ;;  %2564 = vmatpush3.msra.mxu0 %v3910_v44  ;;  %v4774_v5 = vand.u32 4294901760, %v3943_v3  ;;  %v4777_v12 = vand.u32 4294901760, %v3951_v36 }
  0xa5   :  { %2565 = vmatprep.subr.mxu0 %v3915_v28  ;;  %v1279_v31 = vsub.f32 %v3940_v55, %v4772_v4  ;;  %v1161_v4 = vand.u32 4294901760, %v1160_v25  ;;  %v4001_v25 = vand.u32 4294901760, %v976_v27 }
  0xa6   :  { %2593 = vmatpush3.msra.mxu1 %v1133_v61  ;;  %2566 = vmatpush3.msra.mxu0 %v3921_v56  ;;  %v1167_v61 = vsub.f32 %v3943_v3, %v4774_v5  ;;  %v1286_v53 = vsub.f32 %v3951_v36, %v4777_v12 }
  0xa7   :  { %2594 = vmatprep.subr.mxu1 %v1252_v13  ;;  %2567 = vmatprep.subr.mxu0 %v3923_v63  ;;  %v992_v13 = vld [vmem:[#allocation5 + $0xb0] sm:$0xff]  ;;  %v1280_v2 = vand.u32 4294901760, %v1279_v31  ;;  %v4003_v31 = vand.u32 4294901760, %v991_v47  ;;  %v4017_v60 = vsub.f32 %v976_v27, %v4001_v25 }
  0xa8   :  { %2595 = vmatpush3.msra.mxu1 %v1140_v43  ;;  %2568 = vmatpush3.msra.mxu0 %v3925_v51  ;;  %v1273_v43 = vand.u32 4294901760, %v1272_v11  ;;  %v1168_v5 = vand.u32 4294901760, %v1167_v61  ;;  %v3995_v14 = vand.u32 4294901760, %v992_v13  ;;  %v4005_v61 = vand.u32 4294901760, %v975_v41 }
  0xa9   :  { %2596 = vmatprep.subr.mxu1 %v1259_v58  ;;  %2569 = vmatprep.subr.mxu0 %v3932_v37  ;;  %v4779_v58 = vand.u32 4294901760, %v3968_v16  ;;  %4951 = vst [vmem:[#allocation16_spill] sm:$0xff] %v4017_v60  ;;  %v4020_v46 = vsub.f32 %v991_v47, %v4003_v31 }
  0xaa   :  { %2597 = vmatpush3.msra.mxu1 %v1147_v59  ;;  %2570 = vmatpush3.msra.mxu0 %v3953_v54  ;;  %v3985_v59 = vand.u32 4294901760, %v993_v6 }
  0xab   :  { %2598 = vmatprep.subr.mxu1 %v1266_v10  ;;  %v1287_v10 = vand.u32 4294901760, %v1286_v53  ;;  %v1174_v11 = vsub.f32 %v3968_v16, %v4779_v58  ;;  %v4010_v58 = vsub.f32 %v992_v13, %v3995_v14  ;;  %4952 = vst [vmem:[#allocation17_spill] sm:$0xff] %v4020_v46 }
  0xac   :  { %2599 = vmatpush3.msra.mxu1 %v1154_v23  ;;  %v3993_v12 = vsub.f32 %v993_v6, %v3985_v59  ;;  %2571 = vmatprep.subr.mxu0 %v3985_v59  ;;  %v3999_v23 = vsub.f32 %v977_v17, %v3987_v30 }
  0xad   :  { %2600 = vmatprep.subr.mxu1 %v1273_v43  ;;  %v974_v43 = vld [vmem:[#allocation5 + $0x20] sm:$0xff]  ;;  %2572 = vmatpush3.msra.mxu0 %v3987_v30  ;;  %v1175_v6 = vand.u32 4294901760, %v1174_v11  ;;  %4950 = vst [vmem:[#allocation15_spill] sm:$0xff] %v4010_v58 }
  0xae   :  { %4948 = vst [vmem:[#allocation13_spill] sm:$0xff] %v3993_v12  ;;  %2601 = vmatpush3.msra.mxu1 %v1161_v4  ;;  %4949 = vst [vmem:[#allocation14_spill] sm:$0xff] %v3999_v23  ;;  %v4782_v53 = vand.u32 4294901760, %v3993_v12  ;;  %v4012_v4 = vand.u32 4294901760, %v990_v62  ;;  %2573 = vmatprep.subr.mxu0 %v3995_v14  ;;  %v4786_v17 = vand.u32 4294901760, %v3999_v23  ;;  %v4033_v27 = vand.u32 4294901760, %v974_v43 }
  0xaf   :  { %2602 = vmatprep.subr.mxu1 %v1280_v2  ;;  %v4023_v2 = vsub.f32 %v975_v41, %v4005_v61  ;;  %2574 = vmatpush3.msra.mxu0 %v4001_v25  ;;  %v4792_v41 = vand.u32 4294901760, %v4017_v60 }
  0xb0   :  { %2603 = vmatpush3.msra.mxu1 %v1168_v5  ;;  %v1293_v13 = vsub.f32 %v3993_v12, %v4782_v53  ;;  %v4789_v5 = vand.u32 4294901760, %v4010_v58  ;;  %v4031_v11 = vsub.f32 %v990_v62, %v4012_v4  ;;  %2575 = vmatprep.subr.mxu0 %v4003_v31  ;;  %v1181_v47 = vsub.f32 %v3999_v23, %v4786_v17  ;;  %v973_v17 = vld [vmem:[#allocation5 + $0x18] sm:$0xff]  ;;  %v986_v12 = vld [vmem:[#allocation5 + $0x80] sm:$0xff] }
  0xb1   :  { %4953 = vst [vmem:[#allocation18_spill] sm:$0xff] %v4023_v2  ;;  %2604 = vmatprep.subr.mxu1 %v1287_v10  ;;  %v4797_v10 = vand.u32 4294901760, %v4020_v46  ;;  %v4802_v53 = vand.u32 4294901760, %v4023_v2  ;;  %2576 = vmatpush3.msra.mxu0 %v4005_v61  ;;  %v4048_v24 = vsub.f32 %v974_v43, %v4033_v27  ;;  %v1188_v57 = vsub.f32 %v4017_v60, %v4792_v41  ;;  %v972_v60 = vld [vmem:[#allocation5 + $0x10] sm:$0xff] }
  0xb2   :  { %4954 = vst [vmem:[#allocation19_spill] sm:$0xff] %v4031_v11  ;;  %2605 = vmatpush3.msra.mxu1 %v1175_v6  ;;  %v1294_v62 = vand.u32 4294901760, %v1293_v13  ;;  %v1300_v26 = vsub.f32 %v4010_v58, %v4789_v5  ;;  %v4807_v6 = vand.u32 4294901760, %v4031_v11  ;;  %2577 = vmatprep.subr.mxu0 %v4012_v4  ;;  %v1182_v34 = vand.u32 4294901760, %v1181_v47  ;;  %v987_v58 = vld [vmem:[#allocation5 + $0x88] sm:$0xff] }
  0xb3   :  { %4955 = vst [vmem:[#allocation20_spill] sm:$0xff] %v4048_v24  ;;  %v1307_v13 = vsub.f32 %v4020_v46, %v4797_v10  ;;  %v1195_v5 = vsub.f32 %v4023_v2, %v4802_v53  ;;  %2578 = vmatpush3.msra.mxu0 %v4033_v27  ;;  %v4810_v33 = vand.u32 4294901760, %v4048_v24  ;;  %v4065_v41 = vand.u32 4294901760, %v989_v32  ;;  %v971_v10 = vld [vmem:[#allocation5 + $0x8] sm:$0xff] }
  0xb4   :  { %2606 = vmatprep.subr.mxu1 %v1294_v62  ;;  %v1301_v43 = vand.u32 4294901760, %v1300_v26  ;;  %v1314_v47 = vsub.f32 %v4031_v11, %v4807_v6  ;;  %v1189_v46 = vand.u32 4294901760, %v1188_v57  ;;  %v4067_v2 = vand.u32 4294901760, %v973_v17 }
  0xb5   :  { %4956 = vst [vmem:[#allocation24_spill] sm:$0xff] %v4065_v41  ;;  %2607 = vmatpush3.msra.mxu1 %v1182_v34  ;;  %v1308_v23 = vand.u32 4294901760, %v1307_v13  ;;  %v1196_v53 = vand.u32 4294901760, %v1195_v5  ;;  %v1202_v62 = vsub.f32 %v4048_v24, %v4810_v33  ;;  %v4073_v6 = vsub.f32 %v989_v32, %v4065_v41  ;;  %2579 = vmatprep.subr.mxu0 %v4065_v41 }
  0xb6   :  { %4957 = vst [vmem:[#allocation25_spill] sm:$0xff] %v4067_v2  ;;  %2608 = vmatprep.subr.mxu1 %v1301_v43  ;;  %v1315_v26 = vand.u32 4294901760, %v1314_v47  ;;  %v4075_v11 = vand.u32 4294901760, %v988_v9  ;;  %v4079_v57 = vsub.f32 %v973_v17, %v4067_v2  ;;  %v4081_v34 = vand.u32 4294901760, %v972_v60  ;;  %v970_v43 = vld [vmem:[#allocation5] sm:$0xff]  ;;  %2580 = vmatpush3.msra.mxu0 %v4067_v2 }
  0xb7   :  { %4958 = vst [vmem:[#allocation26_spill] sm:$0xff] %v4073_v6  ;;  %2609 = vmatpush3.msra.mxu1 %v1189_v46  ;;  %v4083_v5 = vand.u32 4294901760, %v987_v58  ;;  %v4085_v13 = vand.u32 4294901760, %v971_v10  ;;  %v1203_v32 = vand.u32 4294901760, %v1202_v62  ;;  %v4815_v47 = vand.u32 4294901760, %v4073_v6 }
  0xb8   :  { %4959 = vst [vmem:[#allocation28_spill] sm:$0xff] %v4075_v11  ;;  %4960 = vst [vmem:[#allocation30_spill] sm:$0xff] %v4079_v57  ;;  %2610 = vmatprep.subr.mxu1 %v1308_v23  ;;  %v4090_v33 = vsub.f32 %v988_v9, %v4075_v11  ;;  %v4092_v46 = vand.u32 4294901760, %v986_v12  ;;  %2581 = vmatprep.subr.mxu0 %v4075_v11  ;;  %v4820_v17 = vand.u32 4294901760, %v4079_v57 }
  0xb9   :  { %4961 = vst [vmem:[#allocation21_spill] sm:$0xff] %v4081_v34  ;;  %4962 = vst [vmem:[#allocation22_spill] sm:$0xff] %v4083_v5  ;;  %2611 = vmatpush3.msra.mxu1 %v1196_v53  ;;  %v4097_v24 = vsub.f32 %v972_v60, %v4081_v34  ;;  %v4100_v41 = vsub.f32 %v987_v58, %v4083_v5  ;;  %v4103_v23 = vsub.f32 %v971_v10, %v4085_v13 }
  0xba   :  { %4963 = vst [vmem:[#allocation31_spill] sm:$0xff] %v4085_v13  ;;  %4964 = vst [vmem:[#allocation23_spill] sm:$0xff] %v4090_v33  ;;  %2582 = vmatpush3.msra.mxu0 %v4081_v34  ;;  %2612 = vmatprep.subr.mxu1 %v1315_v26  ;;  %v1321_v9 = vsub.f32 %v4073_v6, %v4815_v47  ;;  %v4111_v62 = vsub.f32 %v986_v12, %v4092_v46  ;;  %v4113_v60 = vand.u32 4294901760, %v970_v43 }
  0xbb   :  { %4965 = vst [vmem:[#allocation29_spill] sm:$0xff] %v4092_v46  ;;  %4966 = vst [vmem:[#allocation32_spill] sm:$0xff] %v4097_v24  ;;  %2583 = vmatprep.subr.mxu0 %v4083_v5  ;;  %2613 = vmatpush3.msra.mxu1 %v1203_v32  ;;  %v1209_v58 = vsub.f32 %v4079_v57, %v4820_v17  ;;  %v4825_v10 = vand.u32 4294901760, %v4097_v24  ;;  %v4971_v12 = vand.u32 4294901760, %v4090_v33  ;;  %v4973_v47 = vand.u32 4294901760, %v4100_v41 }
  0xbc   :  { %4967 = vst [vmem:[#allocation33_spill] sm:$0xff] %v4100_v41  ;;  %4968 = vst [vmem:[#allocation34_spill] sm:$0xff] %v4103_v23  ;;  %2584 = vmatpush3.msra.mxu0 %v4085_v13  ;;  %v1322_v53 = vand.u32 4294901760, %v1321_v9  ;;  %v4830_v5 = vand.u32 4294901760, %v4111_v62  ;;  %v4128_v32 = vsub.f32 %v970_v43, %v4113_v60  ;;  %v4974_v57 = vand.u32 4294901760, %v4103_v23 }
  0xbd   :  { %4969 = vst [vmem:[#allocation35_spill] sm:$0xff] %v4111_v62  ;;  %4970 = vst [vmem:[#allocation36_spill] sm:$0xff] %v4113_v60  ;;  %v1328_v6 = vsub.f32 %v4090_v33, %v4971_v12  ;;  %2585 = vmatprep.subr.mxu0 %v4092_v46  ;;  %v1210_v17 = vand.u32 4294901760, %v1209_v58  ;;  %v1216_v26 = vsub.f32 %v4097_v24, %v4825_v10 }
  0xbe   :  { %4972 = vst [vmem:[#allocation37_spill] sm:$0xff] %v4128_v32  ;;  %v1335_v9 = vsub.f32 %v4100_v41, %v4973_v47  ;;  %v1223_v12 = vsub.f32 %v4103_v23, %v4974_v57  ;;  %2586 = vmatpush3.msra.mxu0 %v4113_v60  ;;  %2614 = vmatprep.subr.mxu1 %v1322_v53  ;;  %v4831_v33 = vand.u32 4294901760, %v4128_v32  ;;  %v103_v53 = vlaneseq }
  0xbf   :  { %v1329_v43 = vand.u32 4294901760, %v1328_v6  ;;  %v1342_v58 = vsub.f32 %v4111_v62, %v4830_v5  ;;  %2625 = vmatprep.subr.mxu0 %v3833_v22  ;;  %2615 = vmatpush3.msra.mxu1 %v1210_v17  ;;  %v1217_v10 = vand.u32 4294901760, %v1216_v26  ;;  %v101_v26 = vld [vmem:[%s4702_s2] sm:$0x3] }
  0xc0   :  { %v1336_v24 = vand.u32 4294901760, %v1335_v9  ;;  %v1224_v47 = vand.u32 4294901760, %v1223_v12  ;;  %v1230_v57 = vsub.f32 %v4128_v32, %v4831_v33  ;;  %v104_v5 = vshrl.u32 %v103_v53, 7 }
  0xc1   :  { %2616 = vmatprep.subr.mxu1 %v1329_v43  ;;  %v1343_v41 = vand.u32 4294901760, %v1342_v58 }
  0xc2   :  { %2617 = vmatpush3.msra.mxu1 %v1217_v10  ;;  %v1231_v6 = vand.u32 4294901760, %v1230_v57  ;;  %v105_v17 = vsub.s32 0, %v104_v5  ;;  %v109_v12 = vsub.s32 1, %v104_v5 }
  0xc3   :  { %2618 = vmatprep.subr.mxu1 %v1336_v24 }
  0xc4   :  { %2619 = vmatpush3.msra.mxu1 %v1224_v47  ;;  %v106_v43 = vrot.slane %v101_v26, %v105_v17  ;;  %v110_v10 = vrot.slane %v101_v26, %v109_v12 }
  0xc5   :  { %2620 = vmatprep.subr.mxu1 %v1343_v41 }
  0xc6   :  { %2621 = vmatpush3.msra.mxu1 %v1231_v6 }
  0xc7   :  { %2660 = vmatprep.subr.mxu1 %v3828_v20 }
 0x113   :  { %v216_v9 = vpop.f32.mrf.mxu0 }
 0x114   :  { %v217_v57 = vadd.f32 %v216_v9, %v106_v43 }
 0x115   :  { %v218_v58 = vpop.f32.mrf.mxu0 }
 0x116   :  { %v219_v41 = vadd.f32 %v218_v58, %v110_v10 }
 0x11a   :  { %v448_v33 = vpop.f32.mrf.mxu1 }
 0x11b   :  { %v449_v32 = vadd.f32 %v448_v33, %v217_v57  ;;  %v4980_v57 = vld [vmem:[#allocation28_spill] sm:$0xff] }
 0x11c   :  { %v450_v47 = vpop.f32.mrf.mxu1 }
 0x11d   :  { %v451_v53 = vadd.f32 %v450_v47, %v219_v41  ;;  %v4981_v47 = vld [vmem:[#allocation16_spill] sm:$0xff]  ;;  %v4982_v41 = vld [vmem:[#allocation21_spill] sm:$0xff] }
 0x133   :  { %v585_v24 = vpop.f32.mrf.mxu0 }
 0x134   :  { %v586_v23 = vadd.f32 %v585_v24, %v449_v32  ;;  %v4979_v24 = vld [vmem:[#allocation15_spill] sm:$0xff] }
 0x135   :  { %v587_v6 = vpop.f32.mrf.mxu0 }
 0x136   :  { %v588_v60 = vadd.f32 %v587_v6, %v451_v53  ;;  %v4983_v6 = vld [vmem:[#allocation17_spill] sm:$0xff]  ;;  %v4984_v53 = vld [vmem:[#allocation22_spill] sm:$0xff] }
 0x13c   :  { %v691_v22 = vpop.f32.mrf.mxu1 }
 0x13d   :  { %v692_v46 = vadd.f32 %v691_v22, %v586_v23  ;;  %v4976_v23 = vld [vmem:[#allocation24_spill] sm:$0xff] }
 0x13e   :  { %v693_v20 = vpop.f32.mrf.mxu1 }
 0x13f   :  { %v694_v34 = vadd.f32 %v693_v20, %v588_v60  ;;  %v4978_v60 = vld [vmem:[#allocation25_spill] sm:$0xff] }
 0x155   :  { %v859_v62 = vpop.f32.mrf.mxu0 }
 0x156   :  { %v860_v5 = vadd.f32 %v859_v62, %v692_v46  ;;  %v4975_v46 = vld [vmem:[#allocation13_spill] sm:$0xff]  ;;  %v4977_v62 = vld [vmem:[#allocation14_spill] sm:$0xff] }
 0x157   :  { %v861_v13 = vpop.f32.mrf.mxu0 }
 0x158   :  { %v862_v11 = vadd.f32 %v861_v13, %v694_v34 }
 0x15d   :  { %v963_v17 = vpop.f32.mrf.mxu1 }
 0x15e   :  { %v964_v2 = vadd.f32 %v963_v17, %v860_v5  ;;  %v4985_v5 = vld [vmem:[#allocation18_spill] sm:$0xff]  ;;  %v4986_v17 = vld [vmem:[#allocation31_spill] sm:$0xff] }
 0x15f   :  { %v965_v26 = vpop.f32.mrf.mxu1 }
 0x160   :  { %v968_v12 = vmax.f32 %v964_v2, 0.0  ;;  %v966_v9 = vadd.f32 %v965_v26, %v862_v11  ;;  %v4987_v26 = vld [vmem:[#allocation19_spill] sm:$0xff] }
 0x162   :  { %v4153_v43 = vand.u32 4294901760, %v968_v12  ;;  %v969_v58 = vmax.f32 %v966_v9, 0.0  ;;  %v4989_v9 = vld [vmem:[#allocation20_spill] sm:$0xff] }
 0x164   :  { %v4156_v33 = vsub.f32 %v968_v12, %v4153_v43  ;;  %v4158_v10 = vand.u32 4294901760, %v969_v58  ;;  %v4988_v12 = vld [vmem:[#allocation29_spill] sm:$0xff] }
 0x166   :  { %v1113_v32 = vand.u32 4294901760, %v4156_v33  ;;  %v1106_v22 = vsub.f32 %v969_v58, %v4158_v10  ;;  %1346 = vmatprep.mubr.f32.mxu1 %v4158_v10  ;;  %v4990_v58 = vld [vmem:[#allocation36_spill] sm:$0xff] }
 0x167   :  { %1348 = vmatmul.mubr.f32.vlgmr.msra.gmra.mxu1 %v4153_v43 }
 0x168   :  { %2661 = vmatpush3.msra.mxu1 %v3830_v48  ;;  %v1107_v20 = vand.u32 4294901760, %v1106_v22  ;;  %v1114_v2 = vsub.f32 %v4156_v33, %v1113_v32 }
 0x169   :  { %2662 = vmatprep.subr.mxu1 %v3835_v1 }
 0x16a   :  { %2663 = vmatpush3.msra.mxu1 %v3841_v15  ;;  %1590 = vmatprep.mubr.f32.mxu1 %v1107_v20  ;;  %v1108_v11 = vsub.f32 %v1106_v22, %v1107_v20  ;;  %v1115_v13 = vand.u32 4294901760, %v1114_v2  ;;  %v4992_v20 = vld [vmem:[#allocation12_spill] sm:$0xff]  ;;  %v4993_v2 = vld [vmem:[#allocation30_spill] sm:$0xff] }
 0x16b   :  { %2664 = vmatprep.subr.mxu1 %v3843_v38 }
 0x16c   :  { %2665 = vmatpush3.msra.mxu1 %v3845_v49  ;;  %v1109_v34 = vand.u32 4294901760, %v1108_v11  ;;  %v4994_v11 = vld [vmem:[#allocation23_spill] sm:$0xff] }
 0x16d   :  { %2666 = vmatprep.subr.mxu1 %v3852_v52 }
 0x16e   :  { %2667 = vmatpush3.msra.mxu1 %v3854_v7  ;;  %1110 = vmatprep.mubr.f32.mxu0 %v1109_v34  ;;  %v4995_v34 = vld [vmem:[#allocation32_spill] sm:$0xff] }
 0x16f   :  { %2668 = vmatprep.subr.mxu1 %v3908_v18  ;;  %1116 = vmatmul.mubr.f32.vlgmr.msra.gmra.mxu0 %v1115_v13  ;;  %v4996_v13 = vld [vmem:[#allocation33_spill] sm:$0xff] }
 0x170   :  { %2626 = vmatpush3.msra.mxu0 %v3839_v42  ;;  %2669 = vmatpush3.msra.mxu1 %v3910_v44 }
 0x171   :  { %2627 = vmatprep.subr.mxu0 %v3850_v35  ;;  %1483 = vmatprep.mubr.f32.mxu0 %v1106_v22  ;;  %v4991_v22 = vld [vmem:[#allocation26_spill] sm:$0xff] }
 0x172   :  { %2670 = vmatprep.subr.mxu1 %v3915_v28  ;;  %2628 = vmatpush3.msra.mxu0 %v3859_v39 }
 0x173   :  { %2671 = vmatpush3.msra.mxu1 %v3921_v56  ;;  %2629 = vmatprep.subr.mxu0 %v3862_v40 }
 0x174   :  { %2672 = vmatprep.subr.mxu1 %v3923_v63  ;;  %2630 = vmatpush3.msra.mxu0 %v3865_v45 }
 0x175   :  { %2673 = vmatpush3.msra.mxu1 %v3925_v51  ;;  %2631 = vmatprep.subr.mxu0 %v3873_v29 }
 0x176   :  { %2674 = vmatprep.subr.mxu1 %v3932_v37  ;;  %2632 = vmatpush3.msra.mxu0 %v3876_v19 }
 0x177   :  { %2675 = vmatpush3.msra.mxu1 %v3953_v54  ;;  %2633 = vmatprep.subr.mxu0 %v3913_v8 }
 0x178   :  { %2676 = vmatprep.subr.mxu1 %v3985_v59  ;;  %2634 = vmatpush3.msra.mxu0 %v3919_v50 }
 0x179   :  { %2677 = vmatpush3.msra.mxu1 %v3987_v30  ;;  %2635 = vmatprep.subr.mxu0 %v3930_v0 }
 0x17a   :  { %2678 = vmatprep.subr.mxu1 %v3995_v14  ;;  %2636 = vmatpush3.msra.mxu0 %v3937_v21 }
 0x17b   :  { %2679 = vmatpush3.msra.mxu1 %v4001_v25  ;;  %2637 = vmatprep.subr.mxu0 %v3940_v55 }
 0x17c   :  { %2680 = vmatprep.subr.mxu1 %v4003_v31  ;;  %2638 = vmatpush3.msra.mxu0 %v3943_v3 }
 0x17d   :  { %2681 = vmatpush3.msra.mxu1 %v4005_v61  ;;  %2639 = vmatprep.subr.mxu0 %v3951_v36 }
 0x17e   :  { %2682 = vmatprep.subr.mxu1 %v4012_v4  ;;  %2640 = vmatpush3.msra.mxu0 %v3968_v16 }
 0x17f   :  { %2683 = vmatpush3.msra.mxu1 %v4033_v27  ;;  %2641 = vmatprep.subr.mxu0 %v4975_v46 }
 0x180   :  { %2684 = vmatprep.subr.mxu1 %v4976_v23  ;;  %2642 = vmatpush3.msra.mxu0 %v4977_v62 }
 0x181   :  { %2685 = vmatpush3.msra.mxu1 %v4978_v60  ;;  %2643 = vmatprep.subr.mxu0 %v4979_v24 }
 0x182   :  { %2686 = vmatprep.subr.mxu1 %v4980_v57  ;;  %2644 = vmatpush3.msra.mxu0 %v4981_v47 }
 0x183   :  { %2687 = vmatpush3.msra.mxu1 %v4982_v41  ;;  %2645 = vmatprep.subr.mxu0 %v4983_v6 }
 0x184   :  { %2688 = vmatprep.subr.mxu1 %v4984_v53  ;;  %2646 = vmatpush3.msra.mxu0 %v4985_v5 }
 0x185   :  { %2689 = vmatpush3.msra.mxu1 %v4986_v17  ;;  %2647 = vmatprep.subr.mxu0 %v4987_v26 }
 0x186   :  { %2690 = vmatprep.subr.mxu1 %v4988_v12  ;;  %2648 = vmatpush3.msra.mxu0 %v4989_v9 }
 0x187   :  { %2691 = vmatpush3.msra.mxu1 %v4990_v58  ;;  %2649 = vmatprep.subr.mxu0 %v4991_v22 }
 0x188   :  { %1594 = vmatmul.mubr.f32.vlgmr.msra.gmra.mxu1 %v1113_v32  ;;  %2730 = vmatprep.subr.mxu1 %v4992_v20  ;;  %v4997_v32 = vld [vmem:[#allocation34_spill] sm:$0xff]  ;;  %v4998_v20 = vld [vmem:[#allocation35_spill] sm:$0xff] }
 0x189   :  { %2650 = vmatpush3.msra.mxu0 %v4993_v2  ;;  %2731 = vmatpush3.msra.mxu1 %v3830_v48  ;;  %v4999_v48 = vld [vmem:[#allocation37_spill] sm:$0xff] }
 0x18a   :  { %1864 = vmatprep.mubr.f32.mxu1 %v4158_v10  ;;  %2651 = vmatprep.subr.mxu0 %v4994_v11 }
 0x18b   :  { %2732 = vmatprep.subr.mxu1 %v3835_v1  ;;  %2652 = vmatpush3.msra.mxu0 %v4995_v34  ;;  %v5000_v1 = vld [vmem:[#allocation27_spill] sm:$0xff] }
 0x18c   :  { %2733 = vmatpush3.msra.mxu1 %v3841_v15  ;;  %2653 = vmatprep.subr.mxu0 %v4996_v13  ;;  %v5001_v15 = vand.u32 4294901760, %v5000_v1 }
 0x18d   :  { %2734 = vmatprep.subr.mxu1 %v3843_v38  ;;  %2654 = vmatpush3.msra.mxu0 %v4997_v32  ;;  %v5002_v38 = vand.u32 4294901760, %v3839_v42  ;;  %v5006_v42 = vand.u32 4294901760, %v3865_v45  ;;  %v5010_v45 = vand.u32 4294901760, %v3919_v50  ;;  %v5017_v50 = vand.u32 4294901760, %v4975_v46 }
 0x18e   :  { %2735 = vmatpush3.msra.mxu1 %v3845_v49  ;;  %2655 = vmatprep.subr.mxu0 %v4998_v20  ;;  %v5003_v49 = vand.u32 4294901760, %v3850_v35  ;;  %v5007_v35 = vand.u32 4294901760, %v3873_v29  ;;  %v5011_v29 = vand.u32 4294901760, %v3930_v0  ;;  %v5022_v0 = vand.u32 4294901760, %v4985_v5 }
 0x18f   :  { %2736 = vmatprep.subr.mxu1 %v3852_v52  ;;  %2656 = vmatpush3.msra.mxu0 %v4999_v48  ;;  %v5004_v52 = vand.u32 4294901760, %v3859_v39  ;;  %v5008_v39 = vand.u32 4294901760, %v3876_v19  ;;  %v5012_v19 = vand.u32 4294901760, %v3937_v21  ;;  %v5024_v21 = vand.u32 4294901760, %v4989_v9 }
 0x190   :  { %2737 = vmatpush3.msra.mxu1 %v3854_v7  ;;  %1486 = vmatmul.mubr.f32.vlgmr.msra.gmra.mxu0 %v4156_v33  ;;  %v5005_v7 = vand.u32 4294901760, %v3862_v40  ;;  %v5009_v40 = vand.u32 4294901760, %v3913_v8  ;;  %v5015_v8 = vand.u32 4294901760, %v3951_v36  ;;  %v5028_v36 = vmov 0.0   ;;  %v1885_v33 = vld [vmem:[#allocation7 + $0x68] sm:$0xff] }
 0x191   :  { %2695 = vmatprep.subr.mxu0 %v5001_v15  ;;  %2738 = vmatprep.subr.mxu1 %v3908_v18  ;;  %v5013_v18 = vand.u32 4294901760, %v3940_v55  ;;  %v5025_v55 = vand.u32 4294901760, %v4991_v22 }
 0x192   :  { %2696 = vmatpush3.msra.mxu0 %v5002_v38  ;;  %1760 = vmatprep.mubr.f32.mxu0 %v4158_v10  ;;  %v1884_v10 = vld [vmem:[#allocation7 + $0x60] sm:$0xff]  ;;  %v1881_v38 = vld [vmem:[#allocation7 + $0x48] sm:$0xff] }
 0x193   :  { %2739 = vmatpush3.msra.mxu1 %v3910_v44  ;;  %2697 = vmatprep.subr.mxu0 %v5003_v49  ;;  %v5014_v44 = vand.u32 4294901760, %v3943_v3  ;;  %v5026_v3 = vand.u32 4294901760, %v4993_v2 }
 0x194   :  { %2740 = vmatprep.subr.mxu1 %v3915_v28  ;;  %2698 = vmatpush3.msra.mxu0 %v5004_v52  ;;  %v5016_v28 = vand.u32 4294901760, %v3968_v16  ;;  %v5030_v16 = vand.u32 4294901760, %v4996_v13 }
 0x195   :  { %2741 = vmatpush3.msra.mxu1 %v3921_v56  ;;  %2699 = vmatprep.subr.mxu0 %v5005_v7  ;;  %v5018_v56 = vand.u32 4294901760, %v4977_v62  ;;  %v4340_v62 = vand.u32 4294901760, %v1884_v10  ;;  %v4399_v7 = vand.u32 4294901760, %v1881_v38 }
 0x196   :  { %2742 = vmatprep.subr.mxu1 %v3923_v63  ;;  %2700 = vmatpush3.msra.mxu0 %v5006_v42  ;;  %v5019_v63 = vand.u32 4294901760, %v4979_v24  ;;  %v1882_v24 = vld [vmem:[#allocation7 + $0x50] sm:$0xff]  ;;  %v1880_v42 = vld [vmem:[#allocation7 + $0x40] sm:$0xff] }
 0x197   :  { %2743 = vmatpush3.msra.mxu1 %v3925_v51  ;;  %2701 = vmatprep.subr.mxu0 %v5007_v35  ;;  %v5020_v51 = vand.u32 4294901760, %v4981_v47  ;;  %v4348_v47 = vand.u32 4294901760, %v1882_v24 }
 0x198   :  { %2744 = vmatprep.subr.mxu1 %v3932_v37  ;;  %2702 = vmatpush3.msra.mxu0 %v5008_v39  ;;  %v5023_v37 = vand.u32 4294901760, %v4987_v26  ;;  %v4405_v39 = vsub.f32 %v1881_v38, %v4399_v7 }
 0x199   :  { %2745 = vmatpush3.msra.mxu1 %v3953_v54  ;;  %2703 = vmatprep.subr.mxu0 %v5009_v40  ;;  %v5029_v54 = vand.u32 4294901760, %v4995_v34  ;;  %v4366_v26 = vsub.f32 %v1882_v24, %v4348_v47  ;;  %v4407_v40 = vand.u32 4294901760, %v1880_v42  ;;  %v1874_v24 = vld [vmem:[#allocation7 + $0x10] sm:$0xff] }
 0x19a   :  { %2746 = vmatprep.subr.mxu1 %v3985_v59  ;;  %2704 = vmatpush3.msra.mxu0 %v5010_v45  ;;  %v5031_v59 = vand.u32 4294901760, %v4997_v32  ;;  %v1879_v45 = vld [vmem:[#allocation7 + $0x38] sm:$0xff] }
 0x19b   :  { %2747 = vmatpush3.msra.mxu1 %v3987_v30  ;;  %2705 = vmatprep.subr.mxu0 %v5011_v29  ;;  %v5027_v30 = vand.u32 4294901760, %v4994_v11 }
 0x19c   :  { %2748 = vmatprep.subr.mxu1 %v3995_v14  ;;  %2706 = vmatpush3.msra.mxu0 %v5012_v19  ;;  %v5021_v14 = vand.u32 4294901760, %v4983_v6  ;;  %v4861_v19 = vand.u32 4294901760, %v4405_v39 }
 0x19d   :  { %2749 = vmatpush3.msra.mxu1 %v4001_v25  ;;  %2707 = vmatprep.subr.mxu0 %v5013_v18  ;;  %v5032_v25 = vand.u32 4294901760, %v4998_v20  ;;  %v2024_v20 = vand.u32 4294901760, %v4366_v26  ;;  %v4414_v18 = vsub.f32 %v1880_v42, %v4407_v40  ;;  %v1872_v42 = vld [vmem:[#allocation7] sm:$0xff] }
 0x19e   :  { %2750 = vmatprep.subr.mxu1 %v4003_v31  ;;  %2708 = vmatpush3.msra.mxu0 %v5014_v44  ;;  %v5033_v31 = vand.u32 4294901760, %v4999_v48  ;;  %v4416_v44 = vand.u32 4294901760, %v1879_v45 }
 0x19f   :  { %2751 = vmatpush3.msra.mxu1 %v4005_v61  ;;  %2709 = vmatprep.subr.mxu0 %v5015_v8  ;;  %v1887_v61 = vld [vmem:[#allocation7 + $0x78] sm:$0xff]  ;;  %v2025_v52 = vsub.f32 %v4366_v26, %v2024_v20  ;;  %v1878_v8 = vld [vmem:[#allocation7 + $0x30] sm:$0xff] }
 0x1a0   :  { %2752 = vmatprep.subr.mxu1 %v4012_v4  ;;  %2710 = vmatpush3.msra.mxu0 %v5016_v28  ;;  %v4334_v4 = vand.u32 4294901760, %v1887_v61  ;;  %v2032_v28 = vsub.f32 %v4405_v39, %v4861_v19 }
 0x1a1   :  { %2753 = vmatpush3.msra.mxu1 %v4033_v27  ;;  %2711 = vmatprep.subr.mxu0 %v5017_v50  ;;  %v1886_v27 = vld [vmem:[#allocation7 + $0x70] sm:$0xff]  ;;  %v2026_v29 = vand.u32 4294901760, %v2025_v52  ;;  %v4860_v50 = vand.u32 4294901760, %v4414_v18 }
 0x1a2   :  { %2754 = vmatprep.subr.mxu1 %v4976_v23  ;;  %2712 = vmatpush3.msra.mxu0 %v5018_v56  ;;  %v4336_v46 = vand.u32 4294901760, %v1886_v27  ;;  %v4338_v23 = vand.u32 4294901760, %v1885_v33  ;;  %v4426_v56 = vsub.f32 %v1879_v45, %v4416_v44 }
 0x1a3   :  { %2755 = vmatpush3.msra.mxu1 %v4978_v60  ;;  %2713 = vmatprep.subr.mxu0 %v5019_v63  ;;  %v1883_v60 = vld [vmem:[#allocation7 + $0x58] sm:$0xff]  ;;  %v4428_v63 = vand.u32 4294901760, %v1878_v8 }
 0x1a4   :  { %2756 = vmatprep.subr.mxu1 %v4980_v57  ;;  %2714 = vmatpush3.msra.mxu0 %v5020_v51  ;;  %v4343_v57 = vsub.f32 %v1887_v61, %v4334_v4  ;;  %v4354_v6 = vsub.f32 %v1885_v33, %v4338_v23  ;;  %v1877_v51 = vld [vmem:[#allocation7 + $0x28] sm:$0xff] }
 0x1a5   :  { %2757 = vmatpush3.msra.mxu1 %v4982_v41  ;;  %2715 = vmatprep.subr.mxu0 %v5021_v14  ;;  %v4351_v41 = vsub.f32 %v1886_v27, %v4336_v46  ;;  %v2033_v14 = vand.u32 4294901760, %v2032_v28  ;;  %v4500_v28 = vand.u32 4294901760, %v1872_v42 }
 0x1a6   :  { %2758 = vmatprep.subr.mxu1 %v4984_v53  ;;  %2716 = vmatpush3.msra.mxu0 %v5022_v0  ;;  %v4357_v53 = vsub.f32 %v1884_v10, %v4340_v62  ;;  %v1989_v5 = vand.u32 4294901760, %v4343_v57  ;;  %v2003_v9 = vand.u32 4294901760, %v4354_v6  ;;  %v2039_v0 = vsub.f32 %v4414_v18, %v4860_v50 }
 0x1a7   :  { %2759 = vmatpush3.msra.mxu1 %v4986_v17  ;;  %2717 = vmatprep.subr.mxu0 %v5023_v37  ;;  %v4859_v37 = vand.u32 4294901760, %v4426_v56 }
 0x1a8   :  { %2760 = vmatprep.subr.mxu1 %v4988_v12  ;;  %2718 = vmatpush3.msra.mxu0 %v5024_v21  ;;  %v1996_v12 = vand.u32 4294901760, %v4351_v41  ;;  %v1990_v22 = vsub.f32 %v4343_v57, %v1989_v5  ;;  %v2004_v34 = vsub.f32 %v4354_v6, %v2003_v9  ;;  %v4438_v21 = vsub.f32 %v1878_v8, %v4428_v63 }
 0x1a9   :  { %2761 = vmatpush3.msra.mxu1 %v4990_v58  ;;  %2719 = vmatprep.subr.mxu0 %v5025_v55  ;;  %v2010_v58 = vand.u32 4294901760, %v4357_v53  ;;  %v4442_v55 = vand.u32 4294901760, %v1877_v51 }
 0x1aa   :  { %1866 = vmatmul.mubr.f32.vlgmr.msra.gmra.mxu1 %v4153_v43  ;;  %2720 = vmatpush3.msra.mxu0 %v5026_v3  ;;  %v1997_v11 = vsub.f32 %v4351_v41, %v1996_v12  ;;  %v1991_v13 = vand.u32 4294901760, %v1990_v22  ;;  %v2005_v1 = vand.u32 4294901760, %v2004_v34  ;;  %v1876_v3 = vld [vmem:[#allocation7 + $0x20] sm:$0xff] }
 0x1ab   :  { %2721 = vmatprep.subr.mxu0 %v5027_v30  ;;  %2902 = vmatprep.subr.mxu1 %v5028_v36  ;;  %v2011_v32 = vsub.f32 %v4357_v53, %v2010_v58  ;;  %v2040_v30 = vand.u32 4294901760, %v2039_v0 }
 0x1ac   :  { %2722 = vmatpush3.msra.mxu0 %v5029_v54  ;;  %v1998_v48 = vand.u32 4294901760, %v1997_v11  ;;  %2903 = vmatpush3.msra.mxu1 %v1991_v13  ;;  %v2046_v54 = vsub.f32 %v4426_v56, %v4859_v37  ;;  %v4472_v13 = vand.u32 4294901760, %v1874_v24 }
 0x1ad   :  { %2723 = vmatprep.subr.mxu0 %v5030_v16  ;;  %2904 = vmatprep.subr.mxu1 %v5028_v36  ;;  %v2012_v49 = vand.u32 4294901760, %v2011_v32  ;;  %v4858_v16 = vand.u32 4294901760, %v4438_v21 }
 0x1ae   :  { %2724 = vmatpush3.msra.mxu0 %v5031_v59  ;;  %2905 = vmatpush3.msra.mxu1 %v1998_v48  ;;  %v4449_v59 = vand.u32 4294901760, %v1876_v3  ;;  %v2047_v61 = vand.u32 4294901760, %v2046_v54  ;;  %v1873_v48 = vld [vmem:[#allocation7 + $0x8] sm:$0xff]  ;;  %v4485_v38 = vsub.f32 %v1874_v24, %v4472_v13 }
 0x1af   :  { %2725 = vmatprep.subr.mxu0 %v5032_v25  ;;  %2906 = vmatprep.subr.mxu1 %v5028_v36  ;;  %v4453_v25 = vsub.f32 %v1877_v51, %v4442_v55  ;;  %v2053_v27 = vsub.f32 %v4438_v21, %v4858_v16 }
 0x1b0   :  { %2726 = vmatpush3.msra.mxu0 %v5033_v31  ;;  %2907 = vmatpush3.msra.mxu1 %v2005_v1  ;;  %v1875_v31 = vld [vmem:[#allocation7 + $0x18] sm:$0xff]  ;;  %v4460_v33 = vsub.f32 %v1876_v3, %v4449_v59  ;;  %v4510_v3 = vsub.f32 %v1872_v42, %v4500_v28 }
 0x1b1   :  { %1762 = vmatmul.mubr.f32.vlgmr.msra.gmra.mxu0 %v4153_v43  ;;  %2867 = vmatprep.subr.mxu0 %v5028_v36  ;;  %v4346_v43 = vand.u32 4294901760, %v1883_v60  ;;  %v4462_v10 = vand.u32 4294901760, %v1875_v31  ;;  %v2054_v22 = vand.u32 4294901760, %v2053_v27 }
 0x1b2   :  { %2868 = vmatpush3.msra.mxu0 %v4334_v4  ;;  %2908 = vmatprep.subr.mxu1 %v5028_v36  ;;  %v4856_v11 = vand.u32 4294901760, %v4460_v33 }
 0x1b3   :  { %2869 = vmatprep.subr.mxu0 %v5028_v36  ;;  %v4362_v17 = vsub.f32 %v1883_v60, %v4346_v43  ;;  %2909 = vmatpush3.msra.mxu1 %v2012_v49  ;;  %v4857_v60 = vand.u32 4294901760, %v4453_v25  ;;  %v4470_v34 = vsub.f32 %v1875_v31, %v4462_v10  ;;  %v4487_v49 = vand.u32 4294901760, %v1873_v48 }
 0x1b4   :  { %2870 = vmatpush3.msra.mxu0 %v4336_v46  ;;  %2910 = vmatprep.subr.mxu1 %v5028_v36  ;;  %v2067_v1 = vsub.f32 %v4460_v33, %v4856_v11  ;;  %v4852_v31 = vand.u32 4294901760, %v4510_v3 }
 0x1b5   :  { %2871 = vmatprep.subr.mxu0 %v5028_v36  ;;  %v2017_v2 = vand.u32 4294901760, %v4362_v17  ;;  %v2060_v32 = vsub.f32 %v4453_v25, %v4857_v60  ;;  %v4497_v8 = vsub.f32 %v1873_v48, %v4487_v49  ;;  %2934 = vmatprep.mubr.msk.f32.mxu1 %vm3181_vm0, %v5028_v36 }
 0x1b6   :  { %2872 = vmatpush3.msra.mxu0 %v4338_v23  ;;  %v2095_v27 = vsub.f32 %v4510_v3, %v4852_v31  ;;  %2899 = vmatprep.mubr.msk.f32.mxu0 %vm3181_vm0, %v5028_v36 }
 0x1b7   :  { %2873 = vmatprep.subr.mxu0 %v5028_v36  ;;  %v2018_v15 = vsub.f32 %v4362_v17, %v2017_v2  ;;  %v2061_v52 = vand.u32 4294901760, %v2060_v32  ;;  %v4853_v0 = vand.u32 4294901760, %v4497_v8 }
 0x1b8   :  { %2874 = vmatpush3.msra.mxu0 %v4340_v62  ;;  %v2096_v24 = vand.u32 4294901760, %v2095_v27 }
 0x1b9   :  { %2875 = vmatprep.subr.mxu0 %v5028_v36  ;;  %v2019_v35 = vand.u32 4294901760, %v2018_v15  ;;  %v4855_v15 = vand.u32 4294901760, %v4470_v34  ;;  %v2088_v54 = vsub.f32 %v4497_v8, %v4853_v0 }
 0x1ba   :  { %2876 = vmatpush3.msra.mxu0 %v4346_v43 }
 0x1bb   :  { %2877 = vmatprep.subr.mxu0 %v5028_v36  ;;  %2911 = vmatpush3.msra.mxu1 %v2019_v35  ;;  %v2068_v35 = vand.u32 4294901760, %v2067_v1  ;;  %v2074_v45 = vsub.f32 %v4470_v34, %v4855_v15 }
 0x1bc   :  { %2878 = vmatpush3.msra.mxu0 %v4348_v47  ;;  %2912 = vmatprep.subr.mxu1 %v5028_v36 }
 0x1bd   :  { %2879 = vmatprep.subr.mxu0 %v5028_v36  ;;  %2913 = vmatpush3.msra.mxu1 %v2026_v29  ;;  %v4854_v29 = vand.u32 4294901760, %v4485_v38  ;;  %v2075_v51 = vand.u32 4294901760, %v2074_v45 }
 0x1be   :  { %2880 = vmatpush3.msra.mxu0 %v4399_v7  ;;  %2914 = vmatprep.subr.mxu1 %v5028_v36 }
 0x1bf   :  { %2881 = vmatprep.subr.mxu0 %v5028_v36  ;;  %2915 = vmatpush3.msra.mxu1 %v2033_v14  ;;  %v2081_v14 = vsub.f32 %v4485_v38, %v4854_v29 }
 0x1c0   :  { %2882 = vmatpush3.msra.mxu0 %v4407_v40  ;;  %2916 = vmatprep.subr.mxu1 %v5028_v36 }
 0x1c1   :  { %2883 = vmatprep.subr.mxu0 %v5028_v36  ;;  %2917 = vmatpush3.msra.mxu1 %v2040_v30  ;;  %v2082_v30 = vand.u32 4294901760, %v2081_v14 }
 0x1c2   :  { %2884 = vmatpush3.msra.mxu0 %v4416_v44  ;;  %2918 = vmatprep.subr.mxu1 %v5028_v36 }
 0x1c3   :  { %2885 = vmatprep.subr.mxu0 %v5028_v36  ;;  %2919 = vmatpush3.msra.mxu1 %v2047_v61  ;;  %v2089_v61 = vand.u32 4294901760, %v2088_v54 }
 0x1c4   :  { %2886 = vmatpush3.msra.mxu0 %v4428_v63  ;;  %2920 = vmatprep.subr.mxu1 %v5028_v36 }
 0x1c5   :  { %2887 = vmatprep.subr.mxu0 %v5028_v36  ;;  %2921 = vmatpush3.msra.mxu1 %v2054_v22 }
 0x1c6   :  { %2888 = vmatpush3.msra.mxu0 %v4442_v55  ;;  %2922 = vmatprep.subr.mxu1 %v5028_v36 }
 0x1c7   :  { %2889 = vmatprep.subr.mxu0 %v5028_v36  ;;  %2923 = vmatpush3.msra.mxu1 %v2061_v52 }
 0x1c8   :  { %2890 = vmatpush3.msra.mxu0 %v4449_v59  ;;  %2924 = vmatprep.subr.mxu1 %v5028_v36 }
 0x1c9   :  { %2891 = vmatprep.subr.mxu0 %v5028_v36  ;;  %2925 = vmatpush3.msra.mxu1 %v2068_v35  ;;  %v2553_v35 = vld [vmem:[%s4704_s4] ss:$0 sm:$0xff] }
 0x1ca   :  { %2892 = vmatpush3.msra.mxu0 %v4462_v10  ;;  %2926 = vmatprep.subr.mxu1 %v5028_v36 }
 0x1cb   :  { %2893 = vmatprep.subr.mxu0 %v5028_v36  ;;  %2927 = vmatpush3.msra.mxu1 %v2075_v51 }
 0x1cc   :  { %2894 = vmatpush3.msra.mxu0 %v4472_v13  ;;  %2928 = vmatprep.subr.mxu1 %v5028_v36 }
 0x1cd   :  { %2895 = vmatprep.subr.mxu0 %v5028_v36  ;;  %2929 = vmatpush3.msra.mxu1 %v2082_v30 }
 0x1ce   :  { %2896 = vmatpush3.msra.mxu0 %v4487_v49  ;;  %2930 = vmatprep.subr.mxu1 %v5028_v36 }
 0x1cf   :  { %2897 = vmatprep.subr.mxu0 %v5028_v36  ;;  %2931 = vmatpush3.msra.mxu1 %v2089_v61 }
 0x1d0   :  { %2898 = vmatpush3.msra.mxu0 %v4500_v28  ;;  %2932 = vmatprep.subr.mxu1 %v5028_v36 }
 0x1d1   :  { %2937 = vmatprep.subr.mxu0 %v5028_v36  ;;  %2933 = vmatpush3.msra.mxu1 %v2096_v24 }
 0x1d2   :  { %2972 = vmatprep.subr.mxu1 %v5028_v36 }
 0x227   :  { %v2622_v32 = vpop.f32.mrf.mxu1 }
 0x229   :  { %v2623_v42 = vpop.f32.mrf.mxu1 }
 0x22a   :  { %v2624_v30 = vadd.f32 %v2623_v42, %v2622_v32 }
 0x22f   :  { %v2587_v22 = vpop.f32.mrf.mxu0 }
 0x231   :  { %v2588_v48 = vpop.f32.mrf.mxu0 }
 0x232   :  { %v2589_v52 = vadd.f32 %v2588_v48, %v2587_v22 }
 0x234   :  { %v1118_v14 = vadd.f32 %v2589_v52, %v2553_v35 }
 0x236   :  { %v1350_v27 = vadd.f32 %v2624_v30, %v1118_v14 }
 0x248   :  { %v2692_v45 = vpop.f32.mrf.mxu1 }
 0x24a   :  { %v2693_v61 = vpop.f32.mrf.mxu1 }
 0x24b   :  { %v2694_v29 = vadd.f32 %v2693_v61, %v2692_v45 }
 0x250   :  { %v2657_v1 = vpop.f32.mrf.mxu0 }
 0x252   :  { %v2658_v51 = vpop.f32.mrf.mxu0 }
 0x253   :  { %v2659_v54 = vadd.f32 %v2658_v51, %v2657_v1 }
 0x255   :  { %v1488_v31 = vadd.f32 %v2659_v54, %v1350_v27 }
 0x257   :  { %v1596_v60 = vadd.f32 %v2694_v29, %v1488_v31 }
 0x26a   :  { %v2762_v24 = vpop.f32.mrf.mxu1 }
 0x26c   :  { %v2763_v15 = vpop.f32.mrf.mxu1 }
 0x26d   :  { %v2764_v48 = vadd.f32 %v2763_v15, %v2762_v24 }
 0x271   :  { %v2727_v0 = vpop.f32.mrf.mxu0 }
 0x273   :  { %v2728_v11 = vpop.f32.mrf.mxu0 }
 0x274   :  { %v2729_v22 = vadd.f32 %v2728_v11, %v2727_v0 }
 0x276   :  { %v1764_v16 = vadd.f32 %v2729_v22, %v1596_v60 }
 0x278   :  { %v1868_v37 = vadd.f32 %v2764_v48, %v1764_v16 }
 0x27a   :  { %v1871_v50 = vmax.f32 %v1868_v37, 0.0 }
 0x27c   :  { %v4533_v19 = vand.u32 4294901760, %v1871_v50 }
 0x27e   :  { %v4536_v52 = vsub.f32 %v1871_v50, %v4533_v19  ;;  %2935 = vmatmul.mubr.f32.vlgmr.msra.gmra.mxu1 %v4533_v19 }
 0x27f   :  { %2973 = vmatpush3.msra.mxu1 %v4334_v4  ;;  %3004 = vmatprep.mubr.msk.f32.mxu1 %vm3181_vm0, %v5028_v36 }
 0x280   :  { %2974 = vmatprep.subr.mxu1 %v5028_v36  ;;  %v1978_v11 = vand.u32 4294901760, %v4536_v52 }
 0x281   :  { %2975 = vmatpush3.msra.mxu1 %v4336_v46 }
 0x282   :  { %2976 = vmatprep.subr.mxu1 %v5028_v36  ;;  %v1979_v37 = vsub.f32 %v4536_v52, %v1978_v11 }
 0x283   :  { %2977 = vmatpush3.msra.mxu1 %v4338_v23 }
 0x284   :  { %2978 = vmatprep.subr.mxu1 %v5028_v36  ;;  %v1980_v50 = vand.u32 4294901760, %v1979_v37 }
 0x285   :  { %2979 = vmatpush3.msra.mxu1 %v4340_v62 }
 0x286   :  { %2980 = vmatprep.subr.mxu1 %v5028_v36  ;;  %2900 = vmatmul.mubr.f32.vlgmr.msra.gmra.mxu0 %v1980_v50 }
 0x287   :  { %2938 = vmatpush3.msra.mxu0 %v4343_v57  ;;  %2981 = vmatpush3.msra.mxu1 %v4346_v43  ;;  %v5038_v57 = vand.u32 4294901760, %v4453_v25 }
 0x288   :  { %2939 = vmatprep.subr.mxu0 %v5028_v36  ;;  %2982 = vmatprep.subr.mxu1 %v5028_v36 }
 0x289   :  { %2940 = vmatpush3.msra.mxu0 %v4351_v41  ;;  %2983 = vmatpush3.msra.mxu1 %v4348_v47  ;;  %v5041_v41 = vand.u32 4294901760, %v4485_v38 }
 0x28a   :  { %2941 = vmatprep.subr.mxu0 %v5028_v36  ;;  %2984 = vmatprep.subr.mxu1 %v5028_v36 }
 0x28b   :  { %2942 = vmatpush3.msra.mxu0 %v4354_v6  ;;  %2985 = vmatpush3.msra.mxu1 %v4399_v7  ;;  %v5042_v6 = vand.u32 4294901760, %v4497_v8 }
 0x28c   :  { %2943 = vmatprep.subr.mxu0 %v5028_v36  ;;  %2986 = vmatprep.subr.mxu1 %v5028_v36 }
 0x28d   :  { %2944 = vmatpush3.msra.mxu0 %v4357_v53  ;;  %2987 = vmatpush3.msra.mxu1 %v4407_v40  ;;  %v5043_v53 = vand.u32 4294901760, %v4510_v3 }
 0x28e   :  { %2945 = vmatprep.subr.mxu0 %v5028_v36  ;;  %2988 = vmatprep.subr.mxu1 %v5028_v36 }
 0x28f   :  { %2946 = vmatpush3.msra.mxu0 %v4362_v17  ;;  %2989 = vmatpush3.msra.mxu1 %v4416_v44 }
 0x290   :  { %2947 = vmatprep.subr.mxu0 %v5028_v36  ;;  %2990 = vmatprep.subr.mxu1 %v5028_v36 }
 0x291   :  { %2948 = vmatpush3.msra.mxu0 %v4366_v26  ;;  %2991 = vmatpush3.msra.mxu1 %v4428_v63 }
 0x292   :  { %2949 = vmatprep.subr.mxu0 %v5028_v36  ;;  %2992 = vmatprep.subr.mxu1 %v5028_v36 }
 0x293   :  { %2950 = vmatpush3.msra.mxu0 %v4405_v39  ;;  %2993 = vmatpush3.msra.mxu1 %v4442_v55 }
 0x294   :  { %2951 = vmatprep.subr.mxu0 %v5028_v36  ;;  %2994 = vmatprep.subr.mxu1 %v5028_v36 }
 0x295   :  { %2952 = vmatpush3.msra.mxu0 %v4414_v18  ;;  %2995 = vmatpush3.msra.mxu1 %v4449_v59 }
 0x296   :  { %2953 = vmatprep.subr.mxu0 %v5028_v36  ;;  %2996 = vmatprep.subr.mxu1 %v5028_v36 }
 0x297   :  { %2954 = vmatpush3.msra.mxu0 %v4426_v56  ;;  %2997 = vmatpush3.msra.mxu1 %v4462_v10 }
 0x298   :  { %2955 = vmatprep.subr.mxu0 %v5028_v36  ;;  %2998 = vmatprep.subr.mxu1 %v5028_v36 }
 0x299   :  { %2956 = vmatpush3.msra.mxu0 %v4438_v21  ;;  %2999 = vmatpush3.msra.mxu1 %v4472_v13 }
 0x29a   :  { %2957 = vmatprep.subr.mxu0 %v5028_v36  ;;  %3000 = vmatprep.subr.mxu1 %v5028_v36 }
 0x29b   :  { %2958 = vmatpush3.msra.mxu0 %v4453_v25  ;;  %3001 = vmatpush3.msra.mxu1 %v4487_v49 }
 0x29c   :  { %2959 = vmatprep.subr.mxu0 %v5028_v36  ;;  %3002 = vmatprep.subr.mxu1 %v5028_v36 }
 0x29d   :  { %2960 = vmatpush3.msra.mxu0 %v4460_v33  ;;  %3003 = vmatpush3.msra.mxu1 %v4500_v28 }
 0x29e   :  { %2961 = vmatprep.subr.mxu0 %v5028_v36  ;;  %3005 = vmatmul.mubr.f32.vlgmr.msra.gmra.mxu1 %v1978_v11 }
 0x29f   :  { %3042 = vmatprep.subr.mxu1 %v5028_v36  ;;  %2962 = vmatpush3.msra.mxu0 %v4470_v34 }
 0x2a0   :  { %3043 = vmatpush3.msra.mxu1 %v4334_v4  ;;  %2963 = vmatprep.subr.mxu0 %v5028_v36  ;;  %v5034_v4 = vand.u32 4294901760, %v4405_v39 }
 0x2a1   :  { %3044 = vmatprep.subr.mxu1 %v5028_v36  ;;  %2964 = vmatpush3.msra.mxu0 %v4485_v38 }
 0x2a2   :  { %3045 = vmatpush3.msra.mxu1 %v4336_v46  ;;  %2965 = vmatprep.subr.mxu0 %v5028_v36  ;;  %v5035_v46 = vand.u32 4294901760, %v4414_v18 }
 0x2a3   :  { %3046 = vmatprep.subr.mxu1 %v5028_v36  ;;  %2966 = vmatpush3.msra.mxu0 %v4497_v8 }
 0x2a4   :  { %3047 = vmatpush3.msra.mxu1 %v4338_v23  ;;  %2967 = vmatprep.subr.mxu0 %v5028_v36  ;;  %v5036_v23 = vand.u32 4294901760, %v4426_v56 }
 0x2a5   :  { %3048 = vmatprep.subr.mxu1 %v5028_v36  ;;  %2968 = vmatpush3.msra.mxu0 %v4510_v3 }
 0x2a6   :  { %2969 = vmatprep.mubr.msk.f32.mxu0 %vm3181_vm0, %v5028_v36  ;;  %3049 = vmatpush3.msra.mxu1 %v4340_v62  ;;  %v5037_v62 = vand.u32 4294901760, %v4438_v21 }
 0x2a7   :  { %2970 = vmatmul.mubr.f32.vlgmr.msra.gmra.mxu0 %v4536_v52  ;;  %3007 = vmatprep.subr.mxu0 %v5028_v36 }
 0x2a8   :  { %3050 = vmatprep.subr.mxu1 %v5028_v36  ;;  %3008 = vmatpush3.msra.mxu0 %v1989_v5 }
 0x2a9   :  { %3051 = vmatpush3.msra.mxu1 %v4346_v43  ;;  %3009 = vmatprep.subr.mxu0 %v5028_v36  ;;  %v5039_v43 = vand.u32 4294901760, %v4460_v33 }
 0x2aa   :  { %3052 = vmatprep.subr.mxu1 %v5028_v36  ;;  %3010 = vmatpush3.msra.mxu0 %v1996_v12 }
 0x2ab   :  { %3053 = vmatpush3.msra.mxu1 %v4348_v47  ;;  %3011 = vmatprep.subr.mxu0 %v5028_v36  ;;  %v5040_v47 = vand.u32 4294901760, %v4470_v34 }
 0x2ac   :  { %3054 = vmatprep.subr.mxu1 %v5028_v36  ;;  %3012 = vmatpush3.msra.mxu0 %v2003_v9 }
 0x2ad   :  { %3055 = vmatpush3.msra.mxu1 %v4399_v7  ;;  %3013 = vmatprep.subr.mxu0 %v5028_v36  ;;  %v2554_v7 = vld [vmem:[%s4706_s6] ss:$0 sm:$0xff] }
 0x2ae   :  { %3056 = vmatprep.subr.mxu1 %v5028_v36  ;;  %3014 = vmatpush3.msra.mxu0 %v2010_v58 }
 0x2af   :  { %3057 = vmatpush3.msra.mxu1 %v4407_v40  ;;  %3015 = vmatprep.subr.mxu0 %v5028_v36 }
 0x2b0   :  { %3058 = vmatprep.subr.mxu1 %v5028_v36  ;;  %3016 = vmatpush3.msra.mxu0 %v2017_v2 }
 0x2b1   :  { %3059 = vmatpush3.msra.mxu1 %v4416_v44  ;;  %3017 = vmatprep.subr.mxu0 %v5028_v36 }
 0x2b2   :  { %3060 = vmatprep.subr.mxu1 %v5028_v36  ;;  %3018 = vmatpush3.msra.mxu0 %v2024_v20 }
 0x2b3   :  { %3061 = vmatpush3.msra.mxu1 %v4428_v63  ;;  %3019 = vmatprep.subr.mxu0 %v5028_v36 }
 0x2b4   :  { %3062 = vmatprep.subr.mxu1 %v5028_v36  ;;  %3020 = vmatpush3.msra.mxu0 %v5034_v4 }
 0x2b5   :  { %3063 = vmatpush3.msra.mxu1 %v4442_v55  ;;  %3021 = vmatprep.subr.mxu0 %v5028_v36 }
 0x2b6   :  { %3064 = vmatprep.subr.mxu1 %v5028_v36  ;;  %3022 = vmatpush3.msra.mxu0 %v5035_v46 }
 0x2b7   :  { %3065 = vmatpush3.msra.mxu1 %v4449_v59  ;;  %3023 = vmatprep.subr.mxu0 %v5028_v36 }
 0x2b8   :  { %3066 = vmatprep.subr.mxu1 %v5028_v36  ;;  %3024 = vmatpush3.msra.mxu0 %v5036_v23 }
 0x2b9   :  { %3067 = vmatpush3.msra.mxu1 %v4462_v10  ;;  %3025 = vmatprep.subr.mxu0 %v5028_v36 }
 0x2ba   :  { %3068 = vmatprep.subr.mxu1 %v5028_v36  ;;  %3026 = vmatpush3.msra.mxu0 %v5037_v62 }
 0x2bb   :  { %3069 = vmatpush3.msra.mxu1 %v4472_v13  ;;  %3027 = vmatprep.subr.mxu0 %v5028_v36 }
 0x2bc   :  { %3070 = vmatprep.subr.mxu1 %v5028_v36  ;;  %3028 = vmatpush3.msra.mxu0 %v5038_v57 }
 0x2bd   :  { %3071 = vmatpush3.msra.mxu1 %v4487_v49  ;;  %3029 = vmatprep.subr.mxu0 %v5028_v36 }
 0x2be   :  { %3072 = vmatprep.subr.mxu1 %v5028_v36  ;;  %3030 = vmatpush3.msra.mxu0 %v5039_v43 }
 0x2bf   :  { %3073 = vmatpush3.msra.mxu1 %v4500_v28  ;;  %3074 = vmatprep.mubr.msk.f32.mxu1 %vm3181_vm0, %v5028_v36 }
 0x2c0   :  { %3031 = vmatprep.subr.mxu0 %v5028_v36  ;;  %3075 = vmatmul.mubr.f32.vlgmr.msra.gmra.mxu1 %v4533_v19 }
 0x2c1   :  { %3032 = vmatpush3.msra.mxu0 %v5040_v47  ;;  %3039 = vmatprep.mubr.msk.f32.mxu0 %vm3181_vm0, %v5028_v36 }
 0x2c2   :  { %3033 = vmatprep.subr.mxu0 %v5028_v36 }
 0x2c3   :  { %3034 = vmatpush3.msra.mxu0 %v5041_v41 }
 0x2c4   :  { %3035 = vmatprep.subr.mxu0 %v5028_v36 }
 0x2c5   :  { %3036 = vmatpush3.msra.mxu0 %v5042_v6 }
 0x2c6   :  { %3037 = vmatprep.subr.mxu0 %v5028_v36 }
 0x2c7   :  { %3038 = vmatpush3.msra.mxu0 %v5043_v53 }
 0x2c8   :  { %3040 = vmatmul.mubr.f32.vlgmr.msra.gmra.mxu0 %v4533_v19 }
 0x33e   :  { %v2133_v5 = vpop.f32.mrf.mxu1 }
 0x340   :  { %v2936_v17 = vpop.f32.mrf.mxu1 }
 0x346   :  { %v1982_v26 = vpop.f32.mrf.mxu0 }
 0x347   :  { %v1983_v39 = vadd.f32 %v2554_v7, %v1982_v26 }
 0x348   :  { %v2901_v12 = vpop.f32.mrf.mxu0 }
 0x349   :  { %v2134_v36 = vadd.f32 %v2133_v5, %v1983_v39 }
 0x35e   :  { %v2326_v9 = vpop.f32.mrf.mxu1 }
 0x360   :  { %v3006_v58 = vpop.f32.mrf.mxu1 }
 0x367   :  { %v2237_v2 = vpop.f32.mrf.mxu0 }
 0x368   :  { %v2238_v44 = vadd.f32 %v2237_v2, %v2134_v36 }
 0x369   :  { %v2971_v20 = vpop.f32.mrf.mxu0 }
 0x36a   :  { %v2327_v56 = vadd.f32 %v2326_v9, %v2238_v44 }
 0x380   :  { %v2532_v40 = vpop.f32.mrf.mxu1 }
 0x382   :  { %v3076_v18 = vpop.f32.mrf.mxu1 }
 0x388   :  { %v2445_v63 = vpop.f32.mrf.mxu0 }
 0x389   :  { %v2446_v19 = vadd.f32 %v2445_v63, %v2327_v56 }
 0x38a   :  { %v3041_v21 = vpop.f32.mrf.mxu0 }
 0x38b   :  { %v2533_v55 = vadd.f32 %v2532_v40, %v2446_v19 }
 0x38d   :  { %2536 = vst [vmem:[#allocation8] sm:$0xff] %v2533_v55 }
 0x38e   :  { %3158 = shalt.err (!%p3155_p5)
}
 0x38f   :  { %2546 = dma.vmem_to_hbm [thread:$0]  %s2544_s23, 128, %s4707_s7, [#allocation4]  }
 0x390   :  { %3171 = dma.done.wait [#allocation4], 128  }
 0x391   :  { %3172 = vsyncadd [#allocation4], 4294967168 }
 0x392   :  { %2550 = vsyncpa [#allocation3], 1 }
 0x393   :  { %2551 = vsyncpa [#allocation6], 1 }
 0x394   :  { %2552 = vsyncpa [#allocation4], 1 }

</bundles_post_ra>
